<compile_context>
chip_gen: v7x
topology: tpu7x:2x2x1
jax: 0.10.0
libtpu: 0.0.40
codegen_flags: <defaults>
</compile_context>

<pallas_src>
import functools
import math

import jax
import jax.numpy as jnp
from jax import lax
from jax.experimental import pallas as pl
from jax.experimental.pallas import tpu as pltpu

# Tversky-index internal weights.
# TODO(synk): exact alpha/beta defaults of MemoryEfficientTverskyLoss are not in
# the provided source; the conventional Tversky defaults (FP weight 0.3, FN
# weight 0.7) are used here.
_TVERSKY_FP = 0.3
_TVERSKY_FN = 0.7
_SMOOTH = 0.0        # smooth=0 as constructed in blobTverskyLoss.forward
_EPS = 1e-8          # denominator clip (as in the MemoryEfficient* losses)

MAX_BLOB_SLOTS = 8   # static bound on blobs per sample (tasks beyond this are dropped)
_OUT_LANES = 128     # lane-dense per-element output row (tasks occupy lanes 0..K)


def _round_up(v, m):
    return ((v + m - 1) // m) * m


def _tversky_kernel(tids_ref,                     # SMEM scalar prefetch: (B, 1+K) int32
                    x_ref, multi_ref, ybin_ref,   # (1,C,TS) f32, (1,1,TS) i32, (1,1,TS) i32
                    out_ref,                      # (1, 1, 128) f32
                    g_ref, pp_ref, mm_ref):       # (CP,NCOL), (CP,TS), (NCOL,TS) f32 scratch
    C = x_ref.shape[1]
    TS = x_ref.shape[2]
    CP = pp_ref.shape[0]
    KP = tids_ref.shape[1]        # 1 + MAX_BLOB_SLOTS
    K = KP - 1
    b = pl.program_id(0)
    s = pl.program_id(1)
    ns = pl.num_programs(1)
    inv_c = jnp.float32(1.0 / C)

    # ---- init per-element accumulators / constant scratch rows ----
    @pl.when(s == 0)
    def _():
        g_ref[...] = jnp.zeros_like(g_ref)
        pp_ref[...] = jnp.zeros_like(pp_ref)
        mm_ref[...] = jnp.zeros_like(mm_ref)
        pp_ref[C:C + 1, :] = jnp.ones((1, TS), jnp.float32)     # pixel-count row

    # ---- softmax over channels, exactly once per (b, spatial tile) ----
    logits = x_ref[0].astype(jnp.float32)                       # (C, TS)
    zmax = jnp.max(logits, axis=0, keepdims=True)               # (1, TS)
    ez = jnp.exp(logits - zmax)                                 # only exp in kernel
    p = ez / jnp.sum(ez, axis=0, keepdims=True)                 # exact reciprocal
    pp_ref[0:C, :] = p

    # ---- mask rows: [valid, y==1, multi==0, blob_0 ... blob_{K-1}] ----
    multi = mm_ref.dtype and multi_ref[0]                       # (1, TS) int32
    ybin = ybin_ref[0]                                          # (1, TS) int32
    mm_ref[0:1, :] = (multi >= 0).astype(jnp.float32)           # pad pixels are -1
    mm_ref[1:2, :] = (ybin > 0).astype(jnp.float32)
    mm_ref[2:3, :] = (multi == 0).astype(jnp.float32)
    for j in range(K):
        tid = tids_ref[b, 1 + j]                                # 0 for padded slots
        mm_ref[3 + j:4 + j, :] = (multi == tid).astype(jnp.float32)

    # ---- every per-task / per-channel segment sum in one MXU matmul ----
    seg = lax.dot_general(pp_ref[...], mm_ref[...],
                          (((1,), (1,)), ((), ())),
                          preferred_element_type=jnp.float32)   # (CP, NCOL)
    g_ref[...] = g_ref[...] + seg

    # ---- finalize: reconstruct every task's Tversky loss from segment sums ----
    @pl.when(s == ns - 1)
    def _():
        g = g_ref[...]                                          # (CP, NCOL)
        cls = lax.broadcasted_iota(jnp.int32, (CP, 1), 0)
        is0 = (cls == 0).astype(jnp.float32)
        is1 = (cls == 1).astype(jnp.float32)
        A = g[:, 0:1]                    # sum_{valid} p[c]
        Y = g[:, 1:2]                    # sum_{y==1} p[c]
        Z = g[:, 2:3]                    # sum_{multi==0} p[c]
        n_tot = g[C:C + 1, 0:1]          # valid pixel count
        n_y = g[C:C + 1, 1:2]
        n_bg = g[C:C + 1, 2:3]
        lane = lax.broadcasted_iota(jnp.int32, (1, 1, _OUT_LANES), 2)
        row = jnp.zeros((1, 1, _OUT_LANES), jnp.float32)
        for t in range(KP):
            if t == 0:
                # main task: binary label, no pixel masking
                tp = is0 * (A - Y) + is1 * Y
                sp = A
                sg = is0 * (n_tot - n_y) + is1 * n_y
            else:
                # blob task: label = (multi==tid); other blobs' pixels masked to 1/C
                Bt = g[:, 2 + t:3 + t]
                n_t = g[C:C + 1, 2 + t:3 + t]
                rest = (n_tot - n_bg - n_t) * inv_c
                tp = is0 * (Z + rest) + is1 * Bt
                sp = Z + Bt + rest
                sg = is0 * (n_tot - n_t) + is1 * n_t
            fp = sp - tp
            fn = sg - tp
            denom = jnp.maximum(tp + _TVERSKY_FP * fp + _TVERSKY_FN * fn + _SMOOTH, _EPS)
            tv = (tp + _SMOOTH) / denom                          # (CP, 1); rows >=2 are 0
            loss_t = -jnp.sum(tv) * inv_c                        # -mean over C classes
            row = jnp.where(lane == t, loss_t, row)
        out_ref[...] = row


def _vmem_limit_bytes():
    try:
        cap = int(pltpu.get_tpu_info().vmem_capacity_bytes)
    except Exception:
        cap = 64 * 1024 * 1024          # conservative (v7x per-TC VMEM)
    return int(min((cap * 3) // 4, 100 * 1024 * 1024))


def _pick_spatial_tile(S, C, CP, NCOL, vmem_limit):
    """Largest spatial tile (multiple of 128, dividing S) whose full VMEM
    footprint (double-buffered inputs + pp/mm scratch) fits within ~1/3 of the
    VMEM limit."""
    per_elem = 4 * (2 * C + 2 * 2 + CP + NCOL)   # bytes per spatial element
    budget = vmem_limit // 3
    cap = max(128, (budget // per_elem) // 128 * 128)
    tile = min(S, cap)
    while S % tile != 0:
        tile -= 128
    return tile


def _run_tversky_tasks(x_flat, multi3, ybin3, task_ids):
    """x_flat (B,C,S) f32, multi3/ybin3 (B,1,S) i32 (S % 128 == 0, pads = -1),
    task_ids (B,1+K) i32.  Returns (B, 1+K) per-task losses."""
    B, C, S = x_flat.shape
    KP = task_ids.shape[1]
    assert KP <= _OUT_LANES
    assert C + 1 <= 8, "kernel assumes <= 7 classes (count row shares the sublane group)"
    CP = _round_up(C + 1, 8)
    NCOL = _round_up(3 + (KP - 1), 8)
    vmem_limit = _vmem_limit_bytes()
    tile_s = _pick_spatial_tile(S, C, CP, NCOL, vmem_limit)
    ns = S // tile_s

    grid_spec = pltpu.PrefetchScalarGridSpec(
        num_scalar_prefetch=1,
        grid=(B, ns),                               # batch (parallel), spatial (reduction, last)
        in_specs=[
            pl.BlockSpec((1, C, tile_s), lambda b, s, tids: (b, 0, s)),
            pl.BlockSpec((1, 1, tile_s), lambda b, s, tids: (b, 0, s)),
            pl.BlockSpec((1, 1, tile_s), lambda b, s, tids: (b, 0, s)),
        ],
        out_specs=pl.BlockSpec((1, 1, _OUT_LANES), lambda b, s, tids: (b, 0, 0)),
        scratch_shapes=[
            pltpu.VMEM((CP, NCOL), jnp.float32),    # segment-sum accumulator
            pltpu.VMEM((CP, tile_s), jnp.float32),  # softmax + count row (MXU lhs)
            pltpu.VMEM((NCOL, tile_s), jnp.float32),# mask rows (MXU rhs)
        ],
    )
    # TODO(synk): when B == 1 on v7x, add a second parallel grid axis (spatial
    # split combined in the wrapper) so both TensorCores are used.
    out = pl.pallas_call(
        _tversky_kernel,
        out_shape=jax.ShapeDtypeStruct((B, 1, _OUT_LANES), jnp.float32),
        grid_spec=grid_spec,
        compiler_params=pltpu.CompilerParams(
            dimension_semantics=("parallel", "arbitrary"),
            vmem_limit_bytes=vmem_limit,
        ),
    )(task_ids, x_flat, multi3, ybin3)
    return out[:, 0, :KP]


def _connected_components_2d(binary_hw):
    """8-connected component labelling: hook (neighbour max) + pointer jumping.
    Returns arbitrary positive integer labels per component, 0 = background."""
    # TODO(synk): get_connected_components' exact connectivity convention is not
    # in the provided source; 8-connectivity (2-D analog of cc3d's 26) is used.
    H, W = binary_hw.shape
    fg = binary_hw > 0
    idx = jnp.arange(1, H * W + 1, dtype=jnp.int32).reshape(H, W)
    lab0 = jnp.where(fg, idx, 0)

    def hook(lab):
        padded = jnp.pad(lab, 1)
        m = lab
        for dy in (-1, 0, 1):
            for dx in (-1, 0, 1):
                if dy == 0 and dx == 0:
                    continue
                m = jnp.maximum(m, padded[1 + dy:1 + dy + H, 1 + dx:1 + dx + W])
        return jnp.where(fg, m, 0)

    def jump(lab):
        flat = lab.reshape(-1)
        parent = flat[jnp.maximum(flat - 1, 0)]
        flat = jnp.where(flat > 0, jnp.maximum(flat, parent), 0)
        return flat.reshape(H, W)

    # TODO(synk): log-step hook+jump converges for practical blob shapes; extremely
    # pathological snake/spiral components could need more iterations.
    n_iter = int(math.ceil(math.log2(max(H * W, 2)))) + 4

    def step(_, lab):
        return jump(jump(hook(lab)))

    return lax.fori_loop(0, n_iter, step, lab0)


@functools.partial(jax.jit, static_argnames=("alpha", "beta"))
def blob_tversky_loss(x, y, alpha=2.0, beta=1.0):
    """x: (B, C, H, W) float logits; y: (B, 1, H, W) int binary segmentation."""
    B, C, H, W = x.shape
    S = H * W
    K = MAX_BLOB_SLOTS

    y2 = y.reshape(B, H, W).astype(jnp.int32)
    multi = jax.vmap(_connected_components_2d)(y2)               # (B, H, W)
    multi_flat = multi.reshape(B, S)
    ybin_flat = y2.reshape(B, S)

    # per-sample blob ids = seed indices of component roots (label == own seed id)
    idx = jnp.arange(1, S + 1, dtype=jnp.int32)[None, :]
    root_vals = jnp.where((multi_flat == idx) & (multi_flat > 0), multi_flat, 0)
    blob_ids = lax.top_k(root_vals, K)[0]                        # (B, K), desc, 0-padded
    valid = blob_ids > 0

    # task 0 of each element = "main" (marker -1), tasks 1..K = its blobs
    task_ids = jnp.concatenate(
        [jnp.full((B, 1), -1, jnp.int32), blob_ids.astype(jnp.int32)], axis=1)

    x_flat = x.reshape(B, C, S).astype(jnp.float32)
    # TODO(synk): on v5e, streaming x as bfloat16 (upcast in-kernel) would halve
    # HBM bytes of the dominant input; kept f32 for reference parity.

    # pad spatial length to a multiple of 128; pad pixels carry multi=-1 and are
    # excluded from every mask column (incl. the "valid" / count column).
    S_pad = _round_up(S, 128)
    if S_pad != S:
        x_flat = jnp.pad(x_flat, ((0, 0), (0, 0), (0, S_pad - S)))
        multi_flat = jnp.pad(multi_flat, ((0, 0), (0, S_pad - S)), constant_values=-1)
        ybin_flat = jnp.pad(ybin_flat, ((0, 0), (0, S_pad - S)), constant_values=0)

    per_task = _run_tversky_tasks(
        x_flat, multi_flat[:, None, :], ybin_flat[:, None, :], task_ids)   # (B, 1+K)

    # ---- main (binary-label) compound loss: criterion weight 0.5 ----
    main_raw = jnp.mean(per_task[:, 0])

    # ---- blob compound loss: mean over blobs per element, mean over elements with blobs ----
    blob_vals = per_task[:, 1:]                                            # (B, K)
    validf = valid.astype(jnp.float32)
    cnt = validf.sum(axis=1)
    elem_sum = (blob_vals * validf).sum(axis=1)
    elem_mean = jnp.where(cnt > 0, elem_sum / jnp.maximum(cnt, 1.0), 0.0)
    has = (cnt > 0).astype(jnp.float32)
    n_has = has.sum()
    blob_raw = jnp.where(n_has > 0, (elem_mean * has).sum() / jnp.maximum(n_has, 1.0), 0.0)

    main_loss = 0.5 * main_raw
    blob_loss = 0.5 * blob_raw
    if alpha > 0 and beta > 0:
        return alpha * main_loss + beta * blob_loss
    elif alpha > 0:
        return main_loss
    else:
        return blob_loss


if __name__ == "__main__":
    key = jax.random.PRNGKey(0)
    B, C, H, W = 2, 4, 16, 16
    x = jax.random.normal(key, (B, C, H, W), dtype=jnp.float32)

    # deterministic binary label with a few blobs per sample
    y = jnp.zeros((B, H, W), dtype=jnp.int32)
    y = y.at[0, 2:5, 2:5].set(1)
    y = y.at[0, 8:12, 9:13].set(1)
    y = y.at[0, 14:16, 0:3].set(1)
    y = y.at[1, 0:4, 10:14].set(1)
    y = y.at[1, 10:14, 2:6].set(1)
    y = y[:, None, :, :]   # (B, 1, H, W), matching the PyTorch label layout

    loss = blob_tversky_loss(x, y, alpha=2.0, beta=1.0)
    loss = jax.block_until_ready(loss)
    print("KERNEL_OK")
</pallas_src>

<mosaic_0001>
module attributes {stable_mosaic.version = 11 : i64} {
  func.func @_tversky_kernel(%arg0: i32, %arg1: i32, %arg2: memref<2x9xi32, #tpu.memory_space<smem>>, %arg3: memref<1x4x256xf32, #tpu.memory_space<vmem>>, %arg4: memref<1x1x256xi32, #tpu.memory_space<vmem>>, %arg5: memref<1x1x256xi32, #tpu.memory_space<vmem>>, %arg6: memref<1x1x128xf32, #tpu.memory_space<vmem>>, %arg7: memref<8x16xf32, #tpu.memory_space<vmem>>, %arg8: memref<8x256xf32, #tpu.memory_space<vmem>>, %arg9: memref<16x256xf32, #tpu.memory_space<vmem>>) attributes {dimension_semantics = [#tpu.dimension_semantics<parallel>, #tpu.dimension_semantics<arbitrary>], iteration_bounds = array<i64: 2, 1>, scalar_prefetch = 1 : i64, scratch_operands = 3 : i64, tpu.core_type = #tpu.core_type<tc>, window_params = [{transform_indices = @transform_0, window_bounds = array<i64: 1, 4, 256>}, {transform_indices = @transform_1, window_bounds = array<i64: 1, 1, 256>}, {transform_indices = @transform_2, window_bounds = array<i64: 1, 1, 256>}, {transform_indices = @transform_3, window_bounds = array<i64: 1, 1, 128>}]} {
    %c0_i32 = arith.constant 0 : i32
    %0 = arith.cmpi eq, %arg1, %c0_i32 : i32
    %1 = arith.extui %0 : i1 to i32
    %c0_i32_0 = arith.constant 0 : i32
    %2 = arith.cmpi ne, %1, %c0_i32_0 : i32
    scf.if %2 {
      %cst_47 = arith.constant 0.000000e+00 : f32
      %99 = vector.broadcast %cst_47 : f32 to vector<8x16xf32>
      %c0_48 = arith.constant 0 : index
      %c0_49 = arith.constant 0 : index
      %100 = vector.load %arg7[%c0_48, %c0_49] : memref<8x16xf32, #tpu.memory_space<vmem>>, vector<8x16xf32>
      tpu.vector_store %arg7[%c0_48, %c0_49], %99 {strides = array<i32>} : memref<8x16xf32, #tpu.memory_space<vmem>>, vector<8x16xf32>,
      %cst_50 = arith.constant 0.000000e+00 : f32
      %101 = vector.broadcast %cst_50 : f32 to vector<8x256xf32>
      %c0_51 = arith.constant 0 : index
      %c0_52 = arith.constant 0 : index
      %102 = vector.load %arg8[%c0_51, %c0_52] : memref<8x256xf32, #tpu.memory_space<vmem>>, vector<8x256xf32>
      tpu.vector_store %arg8[%c0_51, %c0_52], %101 {strides = array<i32>} : memref<8x256xf32, #tpu.memory_space<vmem>>, vector<8x256xf32>,
      %cst_53 = arith.constant 0.000000e+00 : f32
      %103 = vector.broadcast %cst_53 : f32 to vector<16x256xf32>
      %c0_54 = arith.constant 0 : index
      %c0_55 = arith.constant 0 : index
      %104 = vector.load %arg9[%c0_54, %c0_55] : memref<16x256xf32, #tpu.memory_space<vmem>>, vector<16x256xf32>
      tpu.vector_store %arg9[%c0_54, %c0_55], %103 {strides = array<i32>} : memref<16x256xf32, #tpu.memory_space<vmem>>, vector<16x256xf32>,
      %cst_56 = arith.constant 1.000000e+00 : f32
      %105 = vector.broadcast %cst_56 : f32 to vector<1x256xf32>
      %c4_57 = arith.constant 4 : index
      %c0_58 = arith.constant 0 : index
      %106 = vector.load %arg8[%c4_57, %c0_58] : memref<8x256xf32, #tpu.memory_space<vmem>>, vector<1x256xf32>
      tpu.vector_store %arg8[%c4_57, %c0_58], %105 {strides = array<i32>} : memref<8x256xf32, #tpu.memory_space<vmem>>, vector<1x256xf32>,
    } else {
    }
    %c0 = arith.constant 0 : index
    %c0_1 = arith.constant 0 : index
    %c0_2 = arith.constant 0 : index
    %3 = vector.load %arg3[%c0, %c0_1, %c0_2] : memref<1x4x256xf32, #tpu.memory_space<vmem>>, vector<1x4x256xf32>
    %4 = vector.shape_cast %3 : vector<1x4x256xf32> to vector<4x256xf32>
    %cst = arith.constant dense<0xFF800000> : vector<256xf32>
    %5 = vector.multi_reduction <maximumf>, %4, %cst [0] : vector<4x256xf32> to vector<256xf32>
    %6 = vector.shape_cast %5 : vector<256xf32> to vector<1x256xf32>
    %7 = vector.broadcast %6 : vector<1x256xf32> to vector<4x256xf32>
    %8 = arith.subf %4, %7 : vector<4x256xf32>
    %9 = math.exp %8 : vector<4x256xf32>
    %cst_3 = arith.constant dense<0.000000e+00> : vector<256xf32>
    %10 = vector.multi_reduction <add>, %9, %cst_3 [0] : vector<4x256xf32> to vector<256xf32>
    %11 = vector.shape_cast %10 : vector<256xf32> to vector<1x256xf32>
    %12 = vector.broadcast %11 : vector<1x256xf32> to vector<4x256xf32>
    %13 = arith.divf %9, %12 : vector<4x256xf32>
    %c0_4 = arith.constant 0 : index
    %c0_5 = arith.constant 0 : index
    %14 = vector.load %arg8[%c0_4, %c0_5] : memref<8x256xf32, #tpu.memory_space<vmem>>, vector<4x256xf32>
    tpu.vector_store %arg8[%c0_4, %c0_5], %13 {strides = array<i32>} : memref<8x256xf32, #tpu.memory_space<vmem>>, vector<4x256xf32>,
    %c0_6 = arith.constant 0 : index
    %c0_7 = arith.constant 0 : index
    %c0_8 = arith.constant 0 : index
    %15 = vector.load %arg4[%c0_6, %c0_7, %c0_8] : memref<1x1x256xi32, #tpu.memory_space<vmem>>, vector<1x1x256xi32>
    %16 = vector.shape_cast %15 : vector<1x1x256xi32> to vector<1x256xi32>
    %c0_9 = arith.constant 0 : index
    %c0_10 = arith.constant 0 : index
    %c0_11 = arith.constant 0 : index
    %17 = vector.load %arg5[%c0_9, %c0_10, %c0_11] : memref<1x1x256xi32, #tpu.memory_space<vmem>>, vector<1x1x256xi32>
    %18 = vector.shape_cast %17 : vector<1x1x256xi32> to vector<1x256xi32>
    %c0_i32_12 = arith.constant 0 : i32
    %19 = vector.broadcast %c0_i32_12 : i32 to vector<1x256xi32>
    %20 = arith.cmpi sge, %16, %19 : vector<1x256xi32>
    %21 = arith.extui %20 : vector<1x256xi1> to vector<1x256xi32>
    %22 = arith.sitofp %21 : vector<1x256xi32> to vector<1x256xf32>
    %c0_13 = arith.constant 0 : index
    %c0_14 = arith.constant 0 : index
    %23 = vector.load %arg9[%c0_13, %c0_14] : memref<16x256xf32, #tpu.memory_space<vmem>>, vector<1x256xf32>
    tpu.vector_store %arg9[%c0_13, %c0_14], %22 {strides = array<i32>} : memref<16x256xf32, #tpu.memory_space<vmem>>, vector<1x256xf32>,
    %c0_i32_15 = arith.constant 0 : i32
    %24 = vector.broadcast %c0_i32_15 : i32 to vector<1x256xi32>
    %25 = arith.cmpi sgt, %18, %24 : vector<1x256xi32>
    %26 = arith.extui %25 : vector<1x256xi1> to vector<1x256xi32>
    %27 = arith.sitofp %26 : vector<1x256xi32> to vector<1x256xf32>
    %c1 = arith.constant 1 : index
    %c0_16 = arith.constant 0 : index
    %28 = vector.load %arg9[%c1, %c0_16] : memref<16x256xf32, #tpu.memory_space<vmem>>, vector<1x256xf32>
    tpu.vector_store %arg9[%c1, %c0_16], %27 {strides = array<i32>} : memref<16x256xf32, #tpu.memory_space<vmem>>, vector<1x256xf32>,
    %c0_i32_17 = arith.constant 0 : i32
    %29 = vector.broadcast %c0_i32_17 : i32 to vector<1x256xi32>
    %30 = arith.cmpi eq, %16, %29 : vector<1x256xi32>
    %31 = arith.extui %30 : vector<1x256xi1> to vector<1x256xi32>
    %32 = arith.sitofp %31 : vector<1x256xi32> to vector<1x256xf32>
    %c2 = arith.constant 2 : index
    %c0_18 = arith.constant 0 : index
    %33 = vector.load %arg9[%c2, %c0_18] : memref<16x256xf32, #tpu.memory_space<vmem>>, vector<1x256xf32>
    tpu.vector_store %arg9[%c2, %c0_18], %32 {strides = array<i32>} : memref<16x256xf32, #tpu.memory_space<vmem>>, vector<1x256xf32>,
    %34 = arith.index_cast %arg0 : i32 to index
    %c1_19 = arith.constant 1 : index
    %35 = memref.load %arg2[%34, %c1_19] : memref<2x9xi32, #tpu.memory_space<smem>>
    %36 = vector.broadcast %35 : i32 to vector<1x256xi32>
    %37 = arith.cmpi eq, %16, %36 : vector<1x256xi32>
    %38 = arith.extui %37 : vector<1x256xi1> to vector<1x256xi32>
    %39 = arith.sitofp %38 : vector<1x256xi32> to vector<1x256xf32>
    %c3 = arith.constant 3 : index
    %c0_20 = arith.constant 0 : index
    %40 = vector.load %arg9[%c3, %c0_20] : memref<16x256xf32, #tpu.memory_space<vmem>>, vector<1x256xf32>
    tpu.vector_store %arg9[%c3, %c0_20], %39 {strides = array<i32>} : memref<16x256xf32, #tpu.memory_space<vmem>>, vector<1x256xf32>,
    %41 = arith.index_cast %arg0 : i32 to index
    %c2_21 = arith.constant 2 : index
    %42 = memref.load %arg2[%41, %c2_21] : memref<2x9xi32, #tpu.memory_space<smem>>
    %43 = vector.broadcast %42 : i32 to vector<1x256xi32>
    %44 = arith.cmpi eq, %16, %43 : vector<1x256xi32>
    %45 = arith.extui %44 : vector<1x256xi1> to vector<1x256xi32>
    %46 = arith.sitofp %45 : vector<1x256xi32> to vector<1x256xf32>
    %c4 = arith.constant 4 : index
    %c0_22 = arith.constant 0 : index
    %47 = vector.load %arg9[%c4, %c0_22] : memref<16x256xf32, #tpu.memory_space<vmem>>, vector<1x256xf32>
    tpu.vector_store %arg9[%c4, %c0_22], %46 {strides = array<i32>} : memref<16x256xf32, #tpu.memory_space<vmem>>, vector<1x256xf32>,
    %48 = arith.index_cast %arg0 : i32 to index
    %c3_23 = arith.constant 3 : index
    %49 = memref.load %arg2[%48, %c3_23] : memref<2x9xi32, #tpu.memory_space<smem>>
    %50 = vector.broadcast %49 : i32 to vector<1x256xi32>
    %51 = arith.cmpi eq, %16, %50 : vector<1x256xi32>
    %52 = arith.extui %51 : vector<1x256xi1> to vector<1x256xi32>
    %53 = arith.sitofp %52 : vector<1x256xi32> to vector<1x256xf32>
    %c5 = arith.constant 5 : index
    %c0_24 = arith.constant 0 : index
    %54 = vector.load %arg9[%c5, %c0_24] : memref<16x256xf32, #tpu.memory_space<vmem>>, vector<1x256xf32>
    tpu.vector_store %arg9[%c5, %c0_24], %53 {strides = array<i32>} : memref<16x256xf32, #tpu.memory_space<vmem>>, vector<1x256xf32>,
    %55 = arith.index_cast %arg0 : i32 to index
    %c4_25 = arith.constant 4 : index
    %56 = memref.load %arg2[%55, %c4_25] : memref<2x9xi32, #tpu.memory_space<smem>>
    %57 = vector.broadcast %56 : i32 to vector<1x256xi32>
    %58 = arith.cmpi eq, %16, %57 : vector<1x256xi32>
    %59 = arith.extui %58 : vector<1x256xi1> to vector<1x256xi32>
    %60 = arith.sitofp %59 : vector<1x256xi32> to vector<1x256xf32>
    %c6 = arith.constant 6 : index
    %c0_26 = arith.constant 0 : index
    %61 = vector.load %arg9[%c6, %c0_26] : memref<16x256xf32, #tpu.memory_space<vmem>>, vector<1x256xf32>
    tpu.vector_store %arg9[%c6, %c0_26], %60 {strides = array<i32>} : memref<16x256xf32, #tpu.memory_space<vmem>>, vector<1x256xf32>,
    %62 = arith.index_cast %arg0 : i32 to index
    %c5_27 = arith.constant 5 : index
    %63 = memref.load %arg2[%62, %c5_27] : memref<2x9xi32, #tpu.memory_space<smem>>
    %64 = vector.broadcast %63 : i32 to vector<1x256xi32>
    %65 = arith.cmpi eq, %16, %64 : vector<1x256xi32>
    %66 = arith.extui %65 : vector<1x256xi1> to vector<1x256xi32>
    %67 = arith.sitofp %66 : vector<1x256xi32> to vector<1x256xf32>
    %c7 = arith.constant 7 : index
    %c0_28 = arith.constant 0 : index
    %68 = vector.load %arg9[%c7, %c0_28] : memref<16x256xf32, #tpu.memory_space<vmem>>, vector<1x256xf32>
    tpu.vector_store %arg9[%c7, %c0_28], %67 {strides = array<i32>} : memref<16x256xf32, #tpu.memory_space<vmem>>, vector<1x256xf32>,
    %69 = arith.index_cast %arg0 : i32 to index
    %c6_29 = arith.constant 6 : index
    %70 = memref.load %arg2[%69, %c6_29] : memref<2x9xi32, #tpu.memory_space<smem>>
    %71 = vector.broadcast %70 : i32 to vector<1x256xi32>
    %72 = arith.cmpi eq, %16, %71 : vector<1x256xi32>
    %73 = arith.extui %72 : vector<1x256xi1> to vector<1x256xi32>
    %74 = arith.sitofp %73 : vector<1x256xi32> to vector<1x256xf32>
    %c8 = arith.constant 8 : index
    %c0_30 = arith.constant 0 : index
    %75 = vector.load %arg9[%c8, %c0_30] : memref<16x256xf32, #tpu.memory_space<vmem>>, vector<1x256xf32>
    tpu.vector_store %arg9[%c8, %c0_30], %74 {strides = array<i32>} : memref<16x256xf32, #tpu.memory_space<vmem>>, vector<1x256xf32>,
    %76 = arith.index_cast %arg0 : i32 to index
    %c7_31 = arith.constant 7 : index
    %77 = memref.load %arg2[%76, %c7_31] : memref<2x9xi32, #tpu.memory_space<smem>>
    %78 = vector.broadcast %77 : i32 to vector<1x256xi32>
    %79 = arith.cmpi eq, %16, %78 : vector<1x256xi32>
    %80 = arith.extui %79 : vector<1x256xi1> to vector<1x256xi32>
    %81 = arith.sitofp %80 : vector<1x256xi32> to vector<1x256xf32>
    %c9 = arith.constant 9 : index
    %c0_32 = arith.constant 0 : index
    %82 = vector.load %arg9[%c9, %c0_32] : memref<16x256xf32, #tpu.memory_space<vmem>>, vector<1x256xf32>
    tpu.vector_store %arg9[%c9, %c0_32], %81 {strides = array<i32>} : memref<16x256xf32, #tpu.memory_space<vmem>>, vector<1x256xf32>,
    %83 = arith.index_cast %arg0 : i32 to index
    %c8_33 = arith.constant 8 : index
    %84 = memref.load %arg2[%83, %c8_33] : memref<2x9xi32, #tpu.memory_space<smem>>
    %85 = vector.broadcast %84 : i32 to vector<1x256xi32>
    %86 = arith.cmpi eq, %16, %85 : vector<1x256xi32>
    %87 = arith.extui %86 : vector<1x256xi1> to vector<1x256xi32>
    %88 = arith.sitofp %87 : vector<1x256xi32> to vector<1x256xf32>
    %c10 = arith.constant 10 : index
    %c0_34 = arith.constant 0 : index
    %89 = vector.load %arg9[%c10, %c0_34] : memref<16x256xf32, #tpu.memory_space<vmem>>, vector<1x256xf32>
    tpu.vector_store %arg9[%c10, %c0_34], %88 {strides = array<i32>} : memref<16x256xf32, #tpu.memory_space<vmem>>, vector<1x256xf32>,
    %c0_35 = arith.constant 0 : index
    %c0_36 = arith.constant 0 : index
    %90 = vector.load %arg8[%c0_35, %c0_36] : memref<8x256xf32, #tpu.memory_space<vmem>>, vector<8x256xf32>
    %c0_37 = arith.constant 0 : index
    %c0_38 = arith.constant 0 : index
    %91 = vector.load %arg9[%c0_37, %c0_38] : memref<16x256xf32, #tpu.memory_space<vmem>>, vector<16x256xf32>
    %cst_39 = arith.constant dense<0.000000e+00> : vector<8x16xf32>
    %92 = tpu.matmul %90, %91, %cst_39 {dimension_numbers = #tpu.dot_dimension_numbers<[1], [1], [0], [0], [0, 0, 1, 0], [], []>} : vector<8x256xf32>, vector<16x256xf32>, vector<8x16xf32> -> vector<8x16xf32>
    %c0_40 = arith.constant 0 : index
    %c0_41 = arith.constant 0 : index
    %93 = vector.load %arg7[%c0_40, %c0_41] : memref<8x16xf32, #tpu.memory_space<vmem>>, vector<8x16xf32>
    %94 = arith.addf %93, %92 : vector<8x16xf32>
    %c0_42 = arith.constant 0 : index
    %c0_43 = arith.constant 0 : index
    %95 = vector.load %arg7[%c0_42, %c0_43] : memref<8x16xf32, #tpu.memory_space<vmem>>, vector<8x16xf32>
    tpu.vector_store %arg7[%c0_42, %c0_43], %94 {strides = array<i32>} : memref<8x16xf32, #tpu.memory_space<vmem>>, vector<8x16xf32>,
    %c0_i32_44 = arith.constant 0 : i32
    %96 = arith.cmpi eq, %arg1, %c0_i32_44 : i32
    %97 = arith.extui %96 : i1 to i32
    %cst_45 = arith.constant 2.500000e-01 : f32
    %c0_i32_46 = arith.constant 0 : i32
    %98 = arith.cmpi ne, %97, %c0_i32_46 : i32
    scf.if %98 {
      %c0_47 = arith.constant 0 : index
      %c0_48 = arith.constant 0 : index
      %99 = vector.load %arg7[%c0_47, %c0_48] : memref<8x16xf32, #tpu.memory_space<vmem>>, vector<8x16xf32>
      %100 = tpu.iota {dimensions = array<i32: 0>} : vector<8x1xi32>
      %c0_i32_49 = arith.constant 0 : i32
      %101 = vector.broadcast %c0_i32_49 : i32 to vector<8x1xi32>
      %102 = arith.cmpi eq, %100, %101 : vector<8x1xi32>
      %103 = arith.extui %102 : vector<8x1xi1> to vector<8x1xi32>
      %104 = arith.sitofp %103 : vector<8x1xi32> to vector<8x1xf32>
      %c1_i32 = arith.constant 1 : i32
      %105 = vector.broadcast %c1_i32 : i32 to vector<8x1xi32>
      %106 = arith.cmpi eq, %100, %105 : vector<8x1xi32>
      %107 = arith.extui %106 : vector<8x1xi1> to vector<8x1xi32>
      %108 = arith.sitofp %107 : vector<8x1xi32> to vector<8x1xf32>
      %109 = vector.extract_strided_slice %99 {offsets = [0, 0], sizes = [8, 1], strides = [1, 1]} : vector<8x16xf32> to vector<8x1xf32>
      %110 = vector.extract_strided_slice %99 {offsets = [0, 1], sizes = [8, 1], strides = [1, 1]} : vector<8x16xf32> to vector<8x1xf32>
      %111 = vector.extract_strided_slice %99 {offsets = [0, 2], sizes = [8, 1], strides = [1, 1]} : vector<8x16xf32> to vector<8x1xf32>
      %112 = vector.extract_strided_slice %99 {offsets = [4, 0], sizes = [1, 1], strides = [1, 1]} : vector<8x16xf32> to vector<1x1xf32>
      %113 = vector.extract_strided_slice %99 {offsets = [4, 1], sizes = [1, 1], strides = [1, 1]} : vector<8x16xf32> to vector<1x1xf32>
      %114 = vector.extract_strided_slice %99 {offsets = [4, 2], sizes = [1, 1], strides = [1, 1]} : vector<8x16xf32> to vector<1x1xf32>
      %115 = tpu.iota {dimensions = array<i32: 2>} : vector<1x1x128xi32>
      %cst_50 = arith.constant 0.000000e+00 : f32
      %116 = vector.broadcast %cst_50 : f32 to vector<1x1x128xf32>
      %117 = arith.subf %109, %110 : vector<8x1xf32>
      %118 = arith.mulf %104, %117 : vector<8x1xf32>
      %119 = arith.mulf %108, %110 : vector<8x1xf32>
      %120 = arith.addf %118, %119 : vector<8x1xf32>
      %121 = arith.subf %112, %113 : vector<1x1xf32>
      %122 = vector.broadcast %121 : vector<1x1xf32> to vector<8x1xf32>
      %123 = arith.mulf %104, %122 : vector<8x1xf32>
      %124 = vector.broadcast %113 : vector<1x1xf32> to vector<8x1xf32>
      %125 = arith.mulf %108, %124 : vector<8x1xf32>
      %126 = arith.addf %123, %125 : vector<8x1xf32>
      %127 = arith.subf %109, %120 : vector<8x1xf32>
      %128 = arith.subf %126, %120 : vector<8x1xf32>
      %cst_51 = arith.constant 3.000000e-01 : f32
      %129 = vector.broadcast %cst_51 : f32 to vector<8x1xf32>
      %130 = arith.mulf %129, %127 : vector<8x1xf32>
      %131 = arith.addf %120, %130 : vector<8x1xf32>
      %cst_52 = arith.constant 0.699999988 : f32
      %132 = vector.broadcast %cst_52 : f32 to vector<8x1xf32>
      %133 = arith.mulf %132, %128 : vector<8x1xf32>
      %134 = arith.addf %131, %133 : vector<8x1xf32>
      %cst_53 = arith.constant 0.000000e+00 : f32
      %135 = vector.broadcast %cst_53 : f32 to vector<8x1xf32>
      %136 = arith.addf %134, %135 : vector<8x1xf32>
      %cst_54 = arith.constant 9.99999993E-9 : f32
      %137 = vector.broadcast %cst_54 : f32 to vector<8x1xf32>
      %138 = arith.maximumf %136, %137 : vector<8x1xf32>
      %cst_55 = arith.constant 0.000000e+00 : f32
      %139 = vector.broadcast %cst_55 : f32 to vector<8x1xf32>
      %140 = arith.addf %120, %139 : vector<8x1xf32>
      %141 = arith.divf %140, %138 : vector<8x1xf32>
      %142 = vector.shape_cast %141 : vector<8x1xf32> to vector<1x8x1xf32>
      %cst_56 = arith.constant dense<0.000000e+00> : vector<1xf32>
      %143 = vector.multi_reduction <add>, %142, %cst_56 [1, 2] : vector<1x8x1xf32> to vector<1xf32>
      %144 = vector.shape_cast %143 : vector<1xf32> to vector<1x1x1xf32>
      %145 = vector.extract %144[0, 0, 0] : f32 from vector<1x1x1xf32>
      %cst_57 = arith.constant 0.000000e+00 : f32
      %146 = arith.subf %cst_57, %145 : f32
      %147 = arith.mulf %146, %cst_45 : f32
      %c0_i32_58 = arith.constant 0 : i32
      %148 = vector.broadcast %c0_i32_58 : i32 to vector<1x1x128xi32>
      %149 = arith.cmpi eq, %115, %148 : vector<1x1x128xi32>
      %150 = vector.broadcast %147 : f32 to vector<1x1x128xf32>
      %151 = arith.select %149, %150, %116 : vector<1x1x128xi1>, vector<1x1x128xf32>
      %152 = vector.extract_strided_slice %99 {offsets = [0, 3], sizes = [8, 1], strides = [1, 1]} : vector<8x16xf32> to vector<8x1xf32>
      %153 = vector.extract_strided_slice %99 {offsets = [4, 3], sizes = [1, 1], strides = [1, 1]} : vector<8x16xf32> to vector<1x1xf32>
      %154 = arith.subf %112, %114 : vector<1x1xf32>
      %155 = arith.subf %154, %153 : vector<1x1xf32>
      %156 = vector.broadcast %cst_45 : f32 to vector<1x1xf32>
      %157 = arith.mulf %155, %156 : vector<1x1xf32>
      %158 = vector.broadcast %157 : vector<1x1xf32> to vector<8x1xf32>
      %159 = arith.addf %111, %158 : vector<8x1xf32>
      %160 = arith.mulf %104, %159 : vector<8x1xf32>
      %161 = arith.mulf %108, %152 : vector<8x1xf32>
      %162 = arith.addf %160, %161 : vector<8x1xf32>
      %163 = arith.addf %111, %152 : vector<8x1xf32>
      %164 = vector.broadcast %157 : vector<1x1xf32> to vector<8x1xf32>
      %165 = arith.addf %163, %164 : vector<8x1xf32>
      %166 = arith.subf %112, %153 : vector<1x1xf32>
      %167 = vector.broadcast %166 : vector<1x1xf32> to vector<8x1xf32>
      %168 = arith.mulf %104, %167 : vector<8x1xf32>
      %169 = vector.broadcast %153 : vector<1x1xf32> to vector<8x1xf32>
      %170 = arith.mulf %108, %169 : vector<8x1xf32>
      %171 = arith.addf %168, %170 : vector<8x1xf32>
      %172 = arith.subf %165, %162 : vector<8x1xf32>
      %173 = arith.subf %171, %162 : vector<8x1xf32>
      %cst_59 = arith.constant 3.000000e-01 : f32
      %174 = vector.broadcast %cst_59 : f32 to vector<8x1xf32>
      %175 = arith.mulf %174, %172 : vector<8x1xf32>
      %176 = arith.addf %162, %175 : vector<8x1xf32>
      %cst_60 = arith.constant 0.699999988 : f32
      %177 = vector.broadcast %cst_60 : f32 to vector<8x1xf32>
      %178 = arith.mulf %177, %173 : vector<8x1xf32>
      %179 = arith.addf %176, %178 : vector<8x1xf32>
      %cst_61 = arith.constant 0.000000e+00 : f32
      %180 = vector.broadcast %cst_61 : f32 to vector<8x1xf32>
      %181 = arith.addf %179, %180 : vector<8x1xf32>
      %cst_62 = arith.constant 9.99999993E-9 : f32
      %182 = vector.broadcast %cst_62 : f32 to vector<8x1xf32>
      %183 = arith.maximumf %181, %182 : vector<8x1xf32>
      %cst_63 = arith.constant 0.000000e+00 : f32
      %184 = vector.broadcast %cst_63 : f32 to vector<8x1xf32>
      %185 = arith.addf %162, %184 : vector<8x1xf32>
      %186 = arith.divf %185, %183 : vector<8x1xf32>
      %187 = vector.shape_cast %186 : vector<8x1xf32> to vector<1x8x1xf32>
      %cst_64 = arith.constant dense<0.000000e+00> : vector<1xf32>
      %188 = vector.multi_reduction <add>, %187, %cst_64 [1, 2] : vector<1x8x1xf32> to vector<1xf32>
      %189 = vector.shape_cast %188 : vector<1xf32> to vector<1x1x1xf32>
      %190 = vector.extract %189[0, 0, 0] : f32 from vector<1x1x1xf32>
      %cst_65 = arith.constant 0.000000e+00 : f32
      %191 = arith.subf %cst_65, %190 : f32
      %192 = arith.mulf %191, %cst_45 : f32
      %c1_i32_66 = arith.constant 1 : i32
      %193 = vector.broadcast %c1_i32_66 : i32 to vector<1x1x128xi32>
      %194 = arith.cmpi eq, %115, %193 : vector<1x1x128xi32>
      %195 = vector.broadcast %192 : f32 to vector<1x1x128xf32>
      %196 = arith.select %194, %195, %151 : vector<1x1x128xi1>, vector<1x1x128xf32>
      %197 = vector.extract_strided_slice %99 {offsets = [0, 4], sizes = [8, 1], strides = [1, 1]} : vector<8x16xf32> to vector<8x1xf32>
      %198 = vector.extract_strided_slice %99 {offsets = [4, 4], sizes = [1, 1], strides = [1, 1]} : vector<8x16xf32> to vector<1x1xf32>
      %199 = arith.subf %112, %114 : vector<1x1xf32>
      %200 = arith.subf %199, %198 : vector<1x1xf32>
      %201 = vector.broadcast %cst_45 : f32 to vector<1x1xf32>
      %202 = arith.mulf %200, %201 : vector<1x1xf32>
      %203 = vector.broadcast %202 : vector<1x1xf32> to vector<8x1xf32>
      %204 = arith.addf %111, %203 : vector<8x1xf32>
      %205 = arith.mulf %104, %204 : vector<8x1xf32>
      %206 = arith.mulf %108, %197 : vector<8x1xf32>
      %207 = arith.addf %205, %206 : vector<8x1xf32>
      %208 = arith.addf %111, %197 : vector<8x1xf32>
      %209 = vector.broadcast %202 : vector<1x1xf32> to vector<8x1xf32>
      %210 = arith.addf %208, %209 : vector<8x1xf32>
      %211 = arith.subf %112, %198 : vector<1x1xf32>
      %212 = vector.broadcast %211 : vector<1x1xf32> to vector<8x1xf32>
      %213 = arith.mulf %104, %212 : vector<8x1xf32>
      %214 = vector.broadcast %198 : vector<1x1xf32> to vector<8x1xf32>
      %215 = arith.mulf %108, %214 : vector<8x1xf32>
      %216 = arith.addf %213, %215 : vector<8x1xf32>
      %217 = arith.subf %210, %207 : vector<8x1xf32>
      %218 = arith.subf %216, %207 : vector<8x1xf32>
      %cst_67 = arith.constant 3.000000e-01 : f32
      %219 = vector.broadcast %cst_67 : f32 to vector<8x1xf32>
      %220 = arith.mulf %219, %217 : vector<8x1xf32>
      %221 = arith.addf %207, %220 : vector<8x1xf32>
      %cst_68 = arith.constant 0.699999988 : f32
      %222 = vector.broadcast %cst_68 : f32 to vector<8x1xf32>
      %223 = arith.mulf %222, %218 : vector<8x1xf32>
      %224 = arith.addf %221, %223 : vector<8x1xf32>
      %cst_69 = arith.constant 0.000000e+00 : f32
      %225 = vector.broadcast %cst_69 : f32 to vector<8x1xf32>
      %226 = arith.addf %224, %225 : vector<8x1xf32>
      %cst_70 = arith.constant 9.99999993E-9 : f32
      %227 = vector.broadcast %cst_70 : f32 to vector<8x1xf32>
      %228 = arith.maximumf %226, %227 : vector<8x1xf32>
      %cst_71 = arith.constant 0.000000e+00 : f32
      %229 = vector.broadcast %cst_71 : f32 to vector<8x1xf32>
      %230 = arith.addf %207, %229 : vector<8x1xf32>
      %231 = arith.divf %230, %228 : vector<8x1xf32>
      %232 = vector.shape_cast %231 : vector<8x1xf32> to vector<1x8x1xf32>
      %cst_72 = arith.constant dense<0.000000e+00> : vector<1xf32>
      %233 = vector.multi_reduction <add>, %232, %cst_72 [1, 2] : vector<1x8x1xf32> to vector<1xf32>
      %234 = vector.shape_cast %233 : vector<1xf32> to vector<1x1x1xf32>
      %235 = vector.extract %234[0, 0, 0] : f32 from vector<1x1x1xf32>
      %cst_73 = arith.constant 0.000000e+00 : f32
      %236 = arith.subf %cst_73, %235 : f32
      %237 = arith.mulf %236, %cst_45 : f32
      %c2_i32 = arith.constant 2 : i32
      %238 = vector.broadcast %c2_i32 : i32 to vector<1x1x128xi32>
      %239 = arith.cmpi eq, %115, %238 : vector<1x1x128xi32>
      %240 = vector.broadcast %237 : f32 to vector<1x1x128xf32>
      %241 = arith.select %239, %240, %196 : vector<1x1x128xi1>, vector<1x1x128xf32>
      %242 = vector.extract_strided_slice %99 {offsets = [0, 5], sizes = [8, 1], strides = [1, 1]} : vector<8x16xf32> to vector<8x1xf32>
      %243 = vector.extract_strided_slice %99 {offsets = [4, 5], sizes = [1, 1], strides = [1, 1]} : vector<8x16xf32> to vector<1x1xf32>
      %244 = arith.subf %112, %114 : vector<1x1xf32>
      %245 = arith.subf %244, %243 : vector<1x1xf32>
      %246 = vector.broadcast %cst_45 : f32 to vector<1x1xf32>
      %247 = arith.mulf %245, %246 : vector<1x1xf32>
      %248 = vector.broadcast %247 : vector<1x1xf32> to vector<8x1xf32>
      %249 = arith.addf %111, %248 : vector<8x1xf32>
      %250 = arith.mulf %104, %249 : vector<8x1xf32>
      %251 = arith.mulf %108, %242 : vector<8x1xf32>
      %252 = arith.addf %250, %251 : vector<8x1xf32>
      %253 = arith.addf %111, %242 : vector<8x1xf32>
      %254 = vector.broadcast %247 : vector<1x1xf32> to vector<8x1xf32>
      %255 = arith.addf %253, %254 : vector<8x1xf32>
      %256 = arith.subf %112, %243 : vector<1x1xf32>
      %257 = vector.broadcast %256 : vector<1x1xf32> to vector<8x1xf32>
      %258 = arith.mulf %104, %257 : vector<8x1xf32>
      %259 = vector.broadcast %243 : vector<1x1xf32> to vector<8x1xf32>
      %260 = arith.mulf %108, %259 : vector<8x1xf32>
      %261 = arith.addf %258, %260 : vector<8x1xf32>
      %262 = arith.subf %255, %252 : vector<8x1xf32>
      %263 = arith.subf %261, %252 : vector<8x1xf32>
      %cst_74 = arith.constant 3.000000e-01 : f32
      %264 = vector.broadcast %cst_74 : f32 to vector<8x1xf32>
      %265 = arith.mulf %264, %262 : vector<8x1xf32>
      %266 = arith.addf %252, %265 : vector<8x1xf32>
      %cst_75 = arith.constant 0.699999988 : f32
      %267 = vector.broadcast %cst_75 : f32 to vector<8x1xf32>
      %268 = arith.mulf %267, %263 : vector<8x1xf32>
      %269 = arith.addf %266, %268 : vector<8x1xf32>
      %cst_76 = arith.constant 0.000000e+00 : f32
      %270 = vector.broadcast %cst_76 : f32 to vector<8x1xf32>
      %271 = arith.addf %269, %270 : vector<8x1xf32>
      %cst_77 = arith.constant 9.99999993E-9 : f32
      %272 = vector.broadcast %cst_77 : f32 to vector<8x1xf32>
      %273 = arith.maximumf %271, %272 : vector<8x1xf32>
      %cst_78 = arith.constant 0.000000e+00 : f32
      %274 = vector.broadcast %cst_78 : f32 to vector<8x1xf32>
      %275 = arith.addf %252, %274 : vector<8x1xf32>
      %276 = arith.divf %275, %273 : vector<8x1xf32>
      %277 = vector.shape_cast %276 : vector<8x1xf32> to vector<1x8x1xf32>
      %cst_79 = arith.constant dense<0.000000e+00> : vector<1xf32>
      %278 = vector.multi_reduction <add>, %277, %cst_79 [1, 2] : vector<1x8x1xf32> to vector<1xf32>
      %279 = vector.shape_cast %278 : vector<1xf32> to vector<1x1x1xf32>
      %280 = vector.extract %279[0, 0, 0] : f32 from vector<1x1x1xf32>
      %cst_80 = arith.constant 0.000000e+00 : f32
      %281 = arith.subf %cst_80, %280 : f32
      %282 = arith.mulf %281, %cst_45 : f32
      %c3_i32 = arith.constant 3 : i32
      %283 = vector.broadcast %c3_i32 : i32 to vector<1x1x128xi32>
      %284 = arith.cmpi eq, %115, %283 : vector<1x1x128xi32>
      %285 = vector.broadcast %282 : f32 to vector<1x1x128xf32>
      %286 = arith.select %284, %285, %241 : vector<1x1x128xi1>, vector<1x1x128xf32>
      %287 = vector.extract_strided_slice %99 {offsets = [0, 6], sizes = [8, 1], strides = [1, 1]} : vector<8x16xf32> to vector<8x1xf32>
      %288 = vector.extract_strided_slice %99 {offsets = [4, 6], sizes = [1, 1], strides = [1, 1]} : vector<8x16xf32> to vector<1x1xf32>
      %289 = arith.subf %112, %114 : vector<1x1xf32>
      %290 = arith.subf %289, %288 : vector<1x1xf32>
      %291 = vector.broadcast %cst_45 : f32 to vector<1x1xf32>
      %292 = arith.mulf %290, %291 : vector<1x1xf32>
      %293 = vector.broadcast %292 : vector<1x1xf32> to vector<8x1xf32>
      %294 = arith.addf %111, %293 : vector<8x1xf32>
      %295 = arith.mulf %104, %294 : vector<8x1xf32>
      %296 = arith.mulf %108, %287 : vector<8x1xf32>
      %297 = arith.addf %295, %296 : vector<8x1xf32>
      %298 = arith.addf %111, %287 : vector<8x1xf32>
      %299 = vector.broadcast %292 : vector<1x1xf32> to vector<8x1xf32>
      %300 = arith.addf %298, %299 : vector<8x1xf32>
      %301 = arith.subf %112, %288 : vector<1x1xf32>
      %302 = vector.broadcast %301 : vector<1x1xf32> to vector<8x1xf32>
      %303 = arith.mulf %104, %302 : vector<8x1xf32>
      %304 = vector.broadcast %288 : vector<1x1xf32> to vector<8x1xf32>
      %305 = arith.mulf %108, %304 : vector<8x1xf32>
      %306 = arith.addf %303, %305 : vector<8x1xf32>
      %307 = arith.subf %300, %297 : vector<8x1xf32>
      %308 = arith.subf %306, %297 : vector<8x1xf32>
      %cst_81 = arith.constant 3.000000e-01 : f32
      %309 = vector.broadcast %cst_81 : f32 to vector<8x1xf32>
      %310 = arith.mulf %309, %307 : vector<8x1xf32>
      %311 = arith.addf %297, %310 : vector<8x1xf32>
      %cst_82 = arith.constant 0.699999988 : f32
      %312 = vector.broadcast %cst_82 : f32 to vector<8x1xf32>
      %313 = arith.mulf %312, %308 : vector<8x1xf32>
      %314 = arith.addf %311, %313 : vector<8x1xf32>
      %cst_83 = arith.constant 0.000000e+00 : f32
      %315 = vector.broadcast %cst_83 : f32 to vector<8x1xf32>
      %316 = arith.addf %314, %315 : vector<8x1xf32>
      %cst_84 = arith.constant 9.99999993E-9 : f32
      %317 = vector.broadcast %cst_84 : f32 to vector<8x1xf32>
      %318 = arith.maximumf %316, %317 : vector<8x1xf32>
      %cst_85 = arith.constant 0.000000e+00 : f32
      %319 = vector.broadcast %cst_85 : f32 to vector<8x1xf32>
      %320 = arith.addf %297, %319 : vector<8x1xf32>
      %321 = arith.divf %320, %318 : vector<8x1xf32>
      %322 = vector.shape_cast %321 : vector<8x1xf32> to vector<1x8x1xf32>
      %cst_86 = arith.constant dense<0.000000e+00> : vector<1xf32>
      %323 = vector.multi_reduction <add>, %322, %cst_86 [1, 2] : vector<1x8x1xf32> to vector<1xf32>
      %324 = vector.shape_cast %323 : vector<1xf32> to vector<1x1x1xf32>
      %325 = vector.extract %324[0, 0, 0] : f32 from vector<1x1x1xf32>
      %cst_87 = arith.constant 0.000000e+00 : f32
      %326 = arith.subf %cst_87, %325 : f32
      %327 = arith.mulf %326, %cst_45 : f32
      %c4_i32 = arith.constant 4 : i32
      %328 = vector.broadcast %c4_i32 : i32 to vector<1x1x128xi32>
      %329 = arith.cmpi eq, %115, %328 : vector<1x1x128xi32>
      %330 = vector.broadcast %327 : f32 to vector<1x1x128xf32>
      %331 = arith.select %329, %330, %286 : vector<1x1x128xi1>, vector<1x1x128xf32>
      %332 = vector.extract_strided_slice %99 {offsets = [0, 7], sizes = [8, 1], strides = [1, 1]} : vector<8x16xf32> to vector<8x1xf32>
      %333 = vector.extract_strided_slice %99 {offsets = [4, 7], sizes = [1, 1], strides = [1, 1]} : vector<8x16xf32> to vector<1x1xf32>
      %334 = arith.subf %112, %114 : vector<1x1xf32>
      %335 = arith.subf %334, %333 : vector<1x1xf32>
      %336 = vector.broadcast %cst_45 : f32 to vector<1x1xf32>
      %337 = arith.mulf %335, %336 : vector<1x1xf32>
      %338 = vector.broadcast %337 : vector<1x1xf32> to vector<8x1xf32>
      %339 = arith.addf %111, %338 : vector<8x1xf32>
      %340 = arith.mulf %104, %339 : vector<8x1xf32>
      %341 = arith.mulf %108, %332 : vector<8x1xf32>
      %342 = arith.addf %340, %341 : vector<8x1xf32>
      %343 = arith.addf %111, %332 : vector<8x1xf32>
      %344 = vector.broadcast %337 : vector<1x1xf32> to vector<8x1xf32>
      %345 = arith.addf %343, %344 : vector<8x1xf32>
      %346 = arith.subf %112, %333 : vector<1x1xf32>
      %347 = vector.broadcast %346 : vector<1x1xf32> to vector<8x1xf32>
      %348 = arith.mulf %104, %347 : vector<8x1xf32>
      %349 = vector.broadcast %333 : vector<1x1xf32> to vector<8x1xf32>
      %350 = arith.mulf %108, %349 : vector<8x1xf32>
      %351 = arith.addf %348, %350 : vector<8x1xf32>
      %352 = arith.subf %345, %342 : vector<8x1xf32>
      %353 = arith.subf %351, %342 : vector<8x1xf32>
      %cst_88 = arith.constant 3.000000e-01 : f32
      %354 = vector.broadcast %cst_88 : f32 to vector<8x1xf32>
      %355 = arith.mulf %354, %352 : vector<8x1xf32>
      %356 = arith.addf %342, %355 : vector<8x1xf32>
      %cst_89 = arith.constant 0.699999988 : f32
      %357 = vector.broadcast %cst_89 : f32 to vector<8x1xf32>
      %358 = arith.mulf %357, %353 : vector<8x1xf32>
      %359 = arith.addf %356, %358 : vector<8x1xf32>
      %cst_90 = arith.constant 0.000000e+00 : f32
      %360 = vector.broadcast %cst_90 : f32 to vector<8x1xf32>
      %361 = arith.addf %359, %360 : vector<8x1xf32>
      %cst_91 = arith.constant 9.99999993E-9 : f32
      %362 = vector.broadcast %cst_91 : f32 to vector<8x1xf32>
      %363 = arith.maximumf %361, %362 : vector<8x1xf32>
      %cst_92 = arith.constant 0.000000e+00 : f32
      %364 = vector.broadcast %cst_92 : f32 to vector<8x1xf32>
      %365 = arith.addf %342, %364 : vector<8x1xf32>
      %366 = arith.divf %365, %363 : vector<8x1xf32>
      %367 = vector.shape_cast %366 : vector<8x1xf32> to vector<1x8x1xf32>
      %cst_93 = arith.constant dense<0.000000e+00> : vector<1xf32>
      %368 = vector.multi_reduction <add>, %367, %cst_93 [1, 2] : vector<1x8x1xf32> to vector<1xf32>
      %369 = vector.shape_cast %368 : vector<1xf32> to vector<1x1x1xf32>
      %370 = vector.extract %369[0, 0, 0] : f32 from vector<1x1x1xf32>
      %cst_94 = arith.constant 0.000000e+00 : f32
      %371 = arith.subf %cst_94, %370 : f32
      %372 = arith.mulf %371, %cst_45 : f32
      %c5_i32 = arith.constant 5 : i32
      %373 = vector.broadcast %c5_i32 : i32 to vector<1x1x128xi32>
      %374 = arith.cmpi eq, %115, %373 : vector<1x1x128xi32>
      %375 = vector.broadcast %372 : f32 to vector<1x1x128xf32>
      %376 = arith.select %374, %375, %331 : vector<1x1x128xi1>, vector<1x1x128xf32>
      %377 = vector.extract_strided_slice %99 {offsets = [0, 8], sizes = [8, 1], strides = [1, 1]} : vector<8x16xf32> to vector<8x1xf32>
      %378 = vector.extract_strided_slice %99 {offsets = [4, 8], sizes = [1, 1], strides = [1, 1]} : vector<8x16xf32> to vector<1x1xf32>
      %379 = arith.subf %112, %114 : vector<1x1xf32>
      %380 = arith.subf %379, %378 : vector<1x1xf32>
      %381 = vector.broadcast %cst_45 : f32 to vector<1x1xf32>
      %382 = arith.mulf %380, %381 : vector<1x1xf32>
      %383 = vector.broadcast %382 : vector<1x1xf32> to vector<8x1xf32>
      %384 = arith.addf %111, %383 : vector<8x1xf32>
      %385 = arith.mulf %104, %384 : vector<8x1xf32>
      %386 = arith.mulf %108, %377 : vector<8x1xf32>
      %387 = arith.addf %385, %386 : vector<8x1xf32>
      %388 = arith.addf %111, %377 : vector<8x1xf32>
      %389 = vector.broadcast %382 : vector<1x1xf32> to vector<8x1xf32>
      %390 = arith.addf %388, %389 : vector<8x1xf32>
      %391 = arith.subf %112, %378 : vector<1x1xf32>
      %392 = vector.broadcast %391 : vector<1x1xf32> to vector<8x1xf32>
      %393 = arith.mulf %104, %392 : vector<8x1xf32>
      %394 = vector.broadcast %378 : vector<1x1xf32> to vector<8x1xf32>
      %395 = arith.mulf %108, %394 : vector<8x1xf32>
      %396 = arith.addf %393, %395 : vector<8x1xf32>
      %397 = arith.subf %390, %387 : vector<8x1xf32>
      %398 = arith.subf %396, %387 : vector<8x1xf32>
      %cst_95 = arith.constant 3.000000e-01 : f32
      %399 = vector.broadcast %cst_95 : f32 to vector<8x1xf32>
      %400 = arith.mulf %399, %397 : vector<8x1xf32>
      %401 = arith.addf %387, %400 : vector<8x1xf32>
      %cst_96 = arith.constant 0.699999988 : f32
      %402 = vector.broadcast %cst_96 : f32 to vector<8x1xf32>
      %403 = arith.mulf %402, %398 : vector<8x1xf32>
      %404 = arith.addf %401, %403 : vector<8x1xf32>
      %cst_97 = arith.constant 0.000000e+00 : f32
      %405 = vector.broadcast %cst_97 : f32 to vector<8x1xf32>
      %406 = arith.addf %404, %405 : vector<8x1xf32>
      %cst_98 = arith.constant 9.99999993E-9 : f32
      %407 = vector.broadcast %cst_98 : f32 to vector<8x1xf32>
      %408 = arith.maximumf %406, %407 : vector<8x1xf32>
      %cst_99 = arith.constant 0.000000e+00 : f32
      %409 = vector.broadcast %cst_99 : f32 to vector<8x1xf32>
      %410 = arith.addf %387, %409 : vector<8x1xf32>
      %411 = arith.divf %410, %408 : vector<8x1xf32>
      %412 = vector.shape_cast %411 : vector<8x1xf32> to vector<1x8x1xf32>
      %cst_100 = arith.constant dense<0.000000e+00> : vector<1xf32>
      %413 = vector.multi_reduction <add>, %412, %cst_100 [1, 2] : vector<1x8x1xf32> to vector<1xf32>
      %414 = vector.shape_cast %413 : vector<1xf32> to vector<1x1x1xf32>
      %415 = vector.extract %414[0, 0, 0] : f32 from vector<1x1x1xf32>
      %cst_101 = arith.constant 0.000000e+00 : f32
      %416 = arith.subf %cst_101, %415 : f32
      %417 = arith.mulf %416, %cst_45 : f32
      %c6_i32 = arith.constant 6 : i32
      %418 = vector.broadcast %c6_i32 : i32 to vector<1x1x128xi32>
      %419 = arith.cmpi eq, %115, %418 : vector<1x1x128xi32>
      %420 = vector.broadcast %417 : f32 to vector<1x1x128xf32>
      %421 = arith.select %419, %420, %376 : vector<1x1x128xi1>, vector<1x1x128xf32>
      %422 = vector.extract_strided_slice %99 {offsets = [0, 9], sizes = [8, 1], strides = [1, 1]} : vector<8x16xf32> to vector<8x1xf32>
      %423 = vector.extract_strided_slice %99 {offsets = [4, 9], sizes = [1, 1], strides = [1, 1]} : vector<8x16xf32> to vector<1x1xf32>
      %424 = arith.subf %112, %114 : vector<1x1xf32>
      %425 = arith.subf %424, %423 : vector<1x1xf32>
      %426 = vector.broadcast %cst_45 : f32 to vector<1x1xf32>
      %427 = arith.mulf %425, %426 : vector<1x1xf32>
      %428 = vector.broadcast %427 : vector<1x1xf32> to vector<8x1xf32>
      %429 = arith.addf %111, %428 : vector<8x1xf32>
      %430 = arith.mulf %104, %429 : vector<8x1xf32>
      %431 = arith.mulf %108, %422 : vector<8x1xf32>
      %432 = arith.addf %430, %431 : vector<8x1xf32>
      %433 = arith.addf %111, %422 : vector<8x1xf32>
      %434 = vector.broadcast %427 : vector<1x1xf32> to vector<8x1xf32>
      %435 = arith.addf %433, %434 : vector<8x1xf32>
      %436 = arith.subf %112, %423 : vector<1x1xf32>
      %437 = vector.broadcast %436 : vector<1x1xf32> to vector<8x1xf32>
      %438 = arith.mulf %104, %437 : vector<8x1xf32>
      %439 = vector.broadcast %423 : vector<1x1xf32> to vector<8x1xf32>
      %440 = arith.mulf %108, %439 : vector<8x1xf32>
      %441 = arith.addf %438, %440 : vector<8x1xf32>
      %442 = arith.subf %435, %432 : vector<8x1xf32>
      %443 = arith.subf %441, %432 : vector<8x1xf32>
      %cst_102 = arith.constant 3.000000e-01 : f32
      %444 = vector.broadcast %cst_102 : f32 to vector<8x1xf32>
      %445 = arith.mulf %444, %442 : vector<8x1xf32>
      %446 = arith.addf %432, %445 : vector<8x1xf32>
      %cst_103 = arith.constant 0.699999988 : f32
      %447 = vector.broadcast %cst_103 : f32 to vector<8x1xf32>
      %448 = arith.mulf %447, %443 : vector<8x1xf32>
      %449 = arith.addf %446, %448 : vector<8x1xf32>
      %cst_104 = arith.constant 0.000000e+00 : f32
      %450 = vector.broadcast %cst_104 : f32 to vector<8x1xf32>
      %451 = arith.addf %449, %450 : vector<8x1xf32>
      %cst_105 = arith.constant 9.99999993E-9 : f32
      %452 = vector.broadcast %cst_105 : f32 to vector<8x1xf32>
      %453 = arith.maximumf %451, %452 : vector<8x1xf32>
      %cst_106 = arith.constant 0.000000e+00 : f32
      %454 = vector.broadcast %cst_106 : f32 to vector<8x1xf32>
      %455 = arith.addf %432, %454 : vector<8x1xf32>
      %456 = arith.divf %455, %453 : vector<8x1xf32>
      %457 = vector.shape_cast %456 : vector<8x1xf32> to vector<1x8x1xf32>
      %cst_107 = arith.constant dense<0.000000e+00> : vector<1xf32>
      %458 = vector.multi_reduction <add>, %457, %cst_107 [1, 2] : vector<1x8x1xf32> to vector<1xf32>
      %459 = vector.shape_cast %458 : vector<1xf32> to vector<1x1x1xf32>
      %460 = vector.extract %459[0, 0, 0] : f32 from vector<1x1x1xf32>
      %cst_108 = arith.constant 0.000000e+00 : f32
      %461 = arith.subf %cst_108, %460 : f32
      %462 = arith.mulf %461, %cst_45 : f32
      %c7_i32 = arith.constant 7 : i32
      %463 = vector.broadcast %c7_i32 : i32 to vector<1x1x128xi32>
      %464 = arith.cmpi eq, %115, %463 : vector<1x1x128xi32>
      %465 = vector.broadcast %462 : f32 to vector<1x1x128xf32>
      %466 = arith.select %464, %465, %421 : vector<1x1x128xi1>, vector<1x1x128xf32>
      %467 = vector.extract_strided_slice %99 {offsets = [0, 10], sizes = [8, 1], strides = [1, 1]} : vector<8x16xf32> to vector<8x1xf32>
      %468 = vector.extract_strided_slice %99 {offsets = [4, 10], sizes = [1, 1], strides = [1, 1]} : vector<8x16xf32> to vector<1x1xf32>
      %469 = arith.subf %112, %114 : vector<1x1xf32>
      %470 = arith.subf %469, %468 : vector<1x1xf32>
      %471 = vector.broadcast %cst_45 : f32 to vector<1x1xf32>
      %472 = arith.mulf %470, %471 : vector<1x1xf32>
      %473 = vector.broadcast %472 : vector<1x1xf32> to vector<8x1xf32>
      %474 = arith.addf %111, %473 : vector<8x1xf32>
      %475 = arith.mulf %104, %474 : vector<8x1xf32>
      %476 = arith.mulf %108, %467 : vector<8x1xf32>
      %477 = arith.addf %475, %476 : vector<8x1xf32>
      %478 = arith.addf %111, %467 : vector<8x1xf32>
      %479 = vector.broadcast %472 : vector<1x1xf32> to vector<8x1xf32>
      %480 = arith.addf %478, %479 : vector<8x1xf32>
      %481 = arith.subf %112, %468 : vector<1x1xf32>
      %482 = vector.broadcast %481 : vector<1x1xf32> to vector<8x1xf32>
      %483 = arith.mulf %104, %482 : vector<8x1xf32>
      %484 = vector.broadcast %468 : vector<1x1xf32> to vector<8x1xf32>
      %485 = arith.mulf %108, %484 : vector<8x1xf32>
      %486 = arith.addf %483, %485 : vector<8x1xf32>
      %487 = arith.subf %480, %477 : vector<8x1xf32>
      %488 = arith.subf %486, %477 : vector<8x1xf32>
      %cst_109 = arith.constant 3.000000e-01 : f32
      %489 = vector.broadcast %cst_109 : f32 to vector<8x1xf32>
      %490 = arith.mulf %489, %487 : vector<8x1xf32>
      %491 = arith.addf %477, %490 : vector<8x1xf32>
      %cst_110 = arith.constant 0.699999988 : f32
      %492 = vector.broadcast %cst_110 : f32 to vector<8x1xf32>
      %493 = arith.mulf %492, %488 : vector<8x1xf32>
      %494 = arith.addf %491, %493 : vector<8x1xf32>
      %cst_111 = arith.constant 0.000000e+00 : f32
      %495 = vector.broadcast %cst_111 : f32 to vector<8x1xf32>
      %496 = arith.addf %494, %495 : vector<8x1xf32>
      %cst_112 = arith.constant 9.99999993E-9 : f32
      %497 = vector.broadcast %cst_112 : f32 to vector<8x1xf32>
      %498 = arith.maximumf %496, %497 : vector<8x1xf32>
      %cst_113 = arith.constant 0.000000e+00 : f32
      %499 = vector.broadcast %cst_113 : f32 to vector<8x1xf32>
      %500 = arith.addf %477, %499 : vector<8x1xf32>
      %501 = arith.divf %500, %498 : vector<8x1xf32>
      %502 = vector.shape_cast %501 : vector<8x1xf32> to vector<1x8x1xf32>
      %cst_114 = arith.constant dense<0.000000e+00> : vector<1xf32>
      %503 = vector.multi_reduction <add>, %502, %cst_114 [1, 2] : vector<1x8x1xf32> to vector<1xf32>
      %504 = vector.shape_cast %503 : vector<1xf32> to vector<1x1x1xf32>
      %505 = vector.extract %504[0, 0, 0] : f32 from vector<1x1x1xf32>
      %cst_115 = arith.constant 0.000000e+00 : f32
      %506 = arith.subf %cst_115, %505 : f32
      %507 = arith.mulf %506, %cst_45 : f32
      %c8_i32 = arith.constant 8 : i32
      %508 = vector.broadcast %c8_i32 : i32 to vector<1x1x128xi32>
      %509 = arith.cmpi eq, %115, %508 : vector<1x1x128xi32>
      %510 = vector.broadcast %507 : f32 to vector<1x1x128xf32>
      %511 = arith.select %509, %510, %466 : vector<1x1x128xi1>, vector<1x1x128xf32>
      %c0_116 = arith.constant 0 : index
      %c0_117 = arith.constant 0 : index
      %c0_118 = arith.constant 0 : index
      %512 = vector.load %arg6[%c0_116, %c0_117, %c0_118] : memref<1x1x128xf32, #tpu.memory_space<vmem>>, vector<1x1x128xf32>
      tpu.vector_store %arg6[%c0_116, %c0_117, %c0_118], %511 {strides = array<i32>} : memref<1x1x128xf32, #tpu.memory_space<vmem>>, vector<1x1x128xf32>,
    } else {
    }
    return
  }
  func.func @transform_0(%arg0: i32, %arg1: i32, %arg2: memref<2x9xi32, #tpu.memory_space<smem>>) -> (i32, i32, i32) {
    %c0_i32 = arith.constant 0 : i32
    %c0_i32_0 = arith.constant 0 : i32
    return %arg0, %c0_i32, %arg1 : i32, i32, i32
  }
  func.func @transform_1(%arg0: i32, %arg1: i32, %arg2: memref<2x9xi32, #tpu.memory_space<smem>>) -> (i32, i32, i32) {
    %c0_i32 = arith.constant 0 : i32
    %c0_i32_0 = arith.constant 0 : i32
    return %arg0, %c0_i32, %arg1 : i32, i32, i32
  }
  func.func @transform_2(%arg0: i32, %arg1: i32, %arg2: memref<2x9xi32, #tpu.memory_space<smem>>) -> (i32, i32, i32) {
    %c0_i32 = arith.constant 0 : i32
    %c0_i32_0 = arith.constant 0 : i32
    return %arg0, %c0_i32, %arg1 : i32, i32, i32
  }
  func.func @transform_3(%arg0: i32, %arg1: i32, %arg2: memref<2x9xi32, #tpu.memory_space<smem>>) -> (i32, i32, i32) {
    %c0_i32 = arith.constant 0 : i32
    %c0_i32_0 = arith.constant 0 : i32
    %c0_i32_1 = arith.constant 0 : i32
    return %arg0, %c0_i32, %c0_i32_0 : i32, i32, i32
  }
}

</mosaic_0001>

<bundles_post_ra>
// kernel: blob_tversky_loss.1
= control target key start
LH: loop header
LB: loop body
LE: loop exit
PB: predicated region body
PF: predicated region fallthrough
CT: control target
= control target key end

     0   :  { %s1837_s0 = inlined_call_operand.vmem [shape: s32[2,9], index: 0, kind: input, shape index: {}]   ;;  %s1838_s1 = inlined_call_operand.vmem [shape: f32[2,4,256], index: 1, kind: input, shape index: {}]   ;;  %s1839_s2 = inlined_call_operand.vmem [shape: s32[2,1,256], index: 2, kind: input, shape index: {}]   ;;  %s1840_s3 = inlined_call_operand.vmem [shape: s32[2,1,256], index: 3, kind: input, shape index: {}]   ;;  %s1841_s4 = inlined_call_operand.vmem [shape: f32[2,1,128], index: 4, kind: output, shape index: {}]  }
   0x1   :  { %s9_s17 = sshll.u32 %s1837_s0, 4  ;;  %s10_s17 = int_to_ptr.vmem [resolvable:$true] %s9_s17 }
   0x2   :  { %s1339_s18 = scalar_lea.vmem %s10_s17, 32  ;;  %p1344_p1 = scmp.lt.s32.totalorder %s10_s17, %s10_s17 }
   0x3   :  { %p1340_p0 = scmp.ne.s32.totalorder %s10_s17, %s1339_s18  ;;  %p1345_p2 = scmp.lt.s32.totalorder %s1339_s18, %s1339_s18 }
   0x5   :  { %p1346_p3 = por %p1345_p2, %p1344_p1 }
   0x7   :  { %p1347_p4 = pnand %p1346_p3, %p1340_p0 }
   0x9   :  { %1350 = shalt.err (!%p1347_p4)  }
   0xa   :  { %s1377_s19 = smov [#allocation6]  }
   0xb   :  { %12 = dma.vmem_to_smem %s10_s17, 32, %s1377_s19, [#allocation5] }
   0xc   :  { %1363 = dma.done.wait [#allocation5], 32 }
   0xd   :  { %1364 = vsyncadd [#allocation5], 4294967264 }
   0xe   :  { %14 = sfence }
   0xf   :  { %s1419_s20 = smov 0   ;;  %s1421_s21 = smov 0  }
  0x10   :  { %s1423_s22 = smov 0  }
  0x11 LB: > { %s32_s0 = sadd.s32 1, %s1371_s21  ;;  %p1234_p5 = scmp.ge.s32.totalorder %s1375_s22, 1  ;;  %s1375_s22 = sphi %s1423_s22, %s20_s22   ;;  %s1371_s21 = sphi %s1421_s21, %s1845_s21   ;;  %s1367_s20 = sphi %s1419_s20, %s1844_s20  }
  0x12   : > { %p34_p6 = scmp.ge.s32.totalorder %s32_s0, 2  ;;  %p195_p7 = scmp.lt.s32.totalorder %s1375_s22, 3 }
  0x14   : > { %s1847_s0 = smov (%p34_p6, %s32_s0), 0  ;;  %p196_p8 = pnand %p1234_p5, %p195_p7 }
  0x15   : > { %p238_p9 = scmp.lt.s32.totalorder (!%p196_p8), %s1367_s20, 1  ;;  %v280_v0 = vlaneseq (!%p196_p8)  ;;  %s1437_s23 = sshll.u32 (!%p196_p8), %s1367_s20, 7  ;;  %v1378_v1 = vmov (!%p196_p8), 0.0   ;;  %vm272_vm0 = vcmask (!%p196_p8), 130048   ;;  %v1379_v3 = vmov (!%p196_p8), 1.0  }
  0x16   : > { %199 = sbr.rel (%p196_p8) target bundleno = 1180 (0x49c), region = 32  ;;  %276 = vst [vmem:[#allocation4] sm:$0xff] (!%p196_p8), %v1378_v1  ;;  %277 = vst [vmem:[#allocation4 + $0x8] sm:$0xff] (!%p196_p8), %v1378_v1  ;;  %s365_s24 = sadd.s32 (!%p196_p8), 1, %s1437_s23  ;;  %vm291_vm2 = vcmask (!%p196_p8), 1043456  }
  0x17   : > { %278 = vst [vmem:[#allocation4 + $0x10] sm:$0xff] (!%p196_p8), %v1378_v1  ;;  %279 = vst [vmem:[#allocation4 + $0x18] sm:$0xff] (!%p196_p8), %v1378_v1  ;;  %s374_s25 = sadd.s32 (!%p196_p8), 2, %s1437_s23  ;;  %vm1450_vm1 = vcmp.lt.s32.totalorder (!%p196_p8), %v280_v0, 256  ;;  %s1456_s26 = sld [smem:[#allocation6 + %s365_s24]] (!%p196_p8) }
  0x18   : > { %274 = vst [vmem:[#allocation3] sm:$0xff] (!%p196_p8), %v1378_v1  ;;  %275 = vst [vmem:[#allocation3 + $0x8] sm:$0xff] (!%p196_p8), %v1378_v1  ;;  %s1458_s27 = sld [smem:[#allocation6 + %s374_s25]] (!%p196_p8)  ;;  %s383_s13 = sadd.s32 (!%p196_p8), 3, %s1437_s23 }
  0x19   : > { %273 = vst.msk [vmem:[#allocation2] sm:$0xff] (!%p196_p8), %vm272_vm0, %v1378_v1  ;;  %s1484_s14 = sld [smem:[#allocation6 + %s383_s13]] (!%p196_p8)  ;;  %s392_s15 = sadd.s32 (!%p196_p8), 4, %s1437_s23 }
  0x1a   : > { %285 = vst.msk [vmem:[#allocation3 + $0x4] ss:$8 sm:$0x3] (!%p196_p8), %vm1450_vm1, %v1379_v3  ;;  %s401_s16 = sadd.s32 (!%p196_p8), 5, %s1437_s23  ;;  %s393_s17 = sld [smem:[#allocation6 + %s392_s15]] (!%p196_p8) }
  0x1b   : > { %s402_s18 = sld [smem:[#allocation6 + %s401_s16]] (!%p196_p8)  ;;  %s410_s19 = sadd.s32 (!%p196_p8), 6, %s1437_s23 }
  0x1c   : > { %s419_s24 = sadd.s32 (!%p196_p8), 7, %s1437_s23  ;;  %s411_s25 = sld [smem:[#allocation6 + %s410_s19]] (!%p196_p8) }
  0x1d   : > { %s1849_s20 = smov (!%p238_p9, %s1367_s20), 1  ;;  %v367_v14 = vstv %s1456_s26  ;;  %s420_s26 = sld [smem:[#allocation6 + %s419_s24]] }
  0x1e   : > { %s1255_s28 = sshll.u32 %s1849_s20, 3  ;;  %s1237_s29 = sshll.u32 %s1849_s20, 1  ;;  %v376_v15 = vstv %s1458_s27 }
  0x1f   : > { %s245_s6 = scalar_lea.vmem %s1838_s1, %s1255_s28  ;;  %s254_s9 = scalar_lea.vmem %s1839_s2, %s1237_s29  ;;  %v385_v22 = vstv %s1484_s14 }
  0x20   : > { %s263_s12 = scalar_lea.vmem %s1840_s3, %s1237_s29  ;;  %v1473_v4 = vld [vmem:[%s245_s6] sm:$0xff]  ;;  %s428_s27 = sadd.s32 8, %s1437_s23  ;;  %v394_v26 = vstv %s393_s17 }
  0x21   : > { %v1475_v5 = vld [vmem:[%s254_s9] sm:$0x3]  ;;  %v289_v6 = vcombine.high %v1473_v4, %v1473_v4  ;;  %v292_v7 = vsel %vm291_vm2, %v1473_v4, -inf  ;;  %s429_s28 = sld [smem:[#allocation6 + %s428_s27]]  ;;  %v403_v27 = vstv %s402_s18  ;;  %s1380_s23 = smov 124  }
  0x22   : > { %v342_v8 = vld [vmem:[%s263_s12] sm:$0x3]  ;;  %vm343_vm3 = vcmp.ge.s32.totalorder %v1475_v5, 0  ;;  %vm358_vm4 = vcmp.eq.s32.totalorder %v1475_v5, 0  ;;  %v293_v9 = vrot.slane %v292_v7, 4  ;;  %vm368_vm6 = vcmp.eq.s32.totalorder %v1475_v5, %v367_v14  ;;  %s1381_s29 = smov 126  }
  0x23   : > { %v1239_v10 = vsel %vm343_vm3, 1.0, %v1378_v1  ;;  %vm352_vm5 = vcmp.gt.s32.totalorder %v342_v8, 0  ;;  %v1241_v11 = vsel %vm358_vm4, 1.0, %v1378_v1  ;;  %v299_v12 = vsel %vm291_vm2, %v289_v6, -inf  ;;  %s1382_s30 = smov 123   ;;  %s1383_s5 = smov 125  }
  0x24   : > { %350 = vst.msk [vmem:[#allocation4] ss:$8 sm:$0x3] %vm1450_vm1, %v1239_v10  ;;  %v1240_v13 = vsel %vm352_vm5, 1.0, %v1378_v1  ;;  %v294_v16 = vmax.f32 %v292_v7, %v293_v9  ;;  %v300_v17 = vrot.slane %v299_v12, 4  ;;  %vm377_vm7 = vcmp.eq.s32.totalorder %v1475_v5, %v376_v15  ;;  %v513_v10 = vld [vmem:[#allocation2] sm:$0xff] }
  0x25   : > { %362 = vst.msk [vmem:[#allocation4 + $0x2] ss:$8 sm:$0x3] %vm1450_vm1, %v1241_v11  ;;  %356 = vst.msk [vmem:[#allocation4 + $0x1] ss:$8 sm:$0x3] %vm1450_vm1, %v1240_v13  ;;  %vm386_vm8 = vcmp.eq.s32.totalorder %v1475_v5, %v385_v22  ;;  %vm395_vm9 = vcmp.eq.s32.totalorder %v1475_v5, %v394_v26  ;;  %vm404_vm10 = vcmp.eq.s32.totalorder %v1475_v5, %v403_v27  ;;  %v412_v32 = vstv %s411_s25 }
  0x26   : > { %v1243_v18 = vsel %vm368_vm6, 1.0, %v1378_v1  ;;  %v1244_v19 = vsel %vm377_vm7, 1.0, %v1378_v1  ;;  %v295_v20 = vrot.slane %v294_v16, 2  ;;  %v301_v21 = vmax.f32 %v299_v12, %v300_v17  ;;  %s1384_s6 = smov 121   ;;  %s1385_s7 = smov 122  }
  0x27   : > { %372 = vst.msk [vmem:[#allocation4 + $0x3] ss:$8 sm:$0x3] %vm1450_vm1, %v1243_v18  ;;  %381 = vst.msk [vmem:[#allocation4 + $0x4] ss:$8 sm:$0x3] %vm1450_vm1, %v1244_v19  ;;  %v421_v33 = vstv %s420_s26  ;;  %vm413_vm11 = vcmp.eq.s32.totalorder %v1475_v5, %v412_v32  ;;  %v430_v38 = vstv %s429_s28 }
  0x28   : > { %v296_v23 = vmax.f32 %v294_v16, %v295_v20  ;;  %v302_v24 = vrot.slane %v301_v21, 2  ;;  %v1245_v25 = vsel %vm386_vm8, 1.0, %v1378_v1  ;;  %v1246_v30 = vsel %vm395_vm9, 1.0, %v1378_v1  ;;  %s1386_s8 = smov 119   ;;  %s1387_s9 = smov 120  }
  0x29   : > { %390 = vst.msk [vmem:[#allocation4 + $0x5] ss:$8 sm:$0x3] %vm1450_vm1, %v1245_v25  ;;  %v1247_v31 = vsel %vm404_vm10, 1.0, %v1378_v1  ;;  %vm422_vm12 = vcmp.eq.s32.totalorder %v1475_v5, %v421_v33  ;;  %v1248_v36 = vsel %vm413_vm11, 1.0, %v1378_v1  ;;  %vm431_vm13 = vcmp.eq.s32.totalorder %v1475_v5, %v430_v38  ;;  %s1388_s10 = smov 118  }
  0x2a   : > { %v297_v28 = vrot.slane %v296_v23, 1  ;;  %v303_v29 = vmax.f32 %v301_v21, %v302_v24  ;;  %399 = vst.msk [vmem:[#allocation4 + $0x6] ss:$8 sm:$0x3] %vm1450_vm1, %v1246_v30  ;;  %v1249_v37 = vsel %vm422_vm12, 1.0, %v1378_v1  ;;  %v1250_v40 = vsel %vm431_vm13, 1.0, %v1378_v1 }
  0x2b   : > { %408 = vst.msk [vmem:[#allocation4 + $0x7] ss:$8 sm:$0x3] %vm1450_vm1, %v1247_v31  ;;  %417 = vst.msk [vmem:[#allocation4 + $0x10] ss:$8 sm:$0x3] %vm1450_vm1, %v1248_v36 }
  0x2c   : > { %v298_v34 = vmax.f32 %v296_v23, %v297_v28  ;;  %v304_v35 = vrot.slane %v303_v29, 1  ;;  %426 = vst.msk [vmem:[#allocation4 + $0x11] ss:$8 sm:$0x3] %vm1450_vm1, %v1249_v37  ;;  %v1551_v15 = vshrl.u32 %v280_v0, 7  ;;  %s1389_s11 = smov 127  }
  0x2d   : > { %435 = vst.msk [vmem:[#allocation4 + $0x12] ss:$8 sm:$0x3] %vm1450_vm1, %v1250_v40  ;;  %s1390_s12 = smov 2  }
  0x2e   : > { %v305_v39 = vmax.f32 %v303_v29, %v304_v35  ;;  %vm526_vm14 = vcmp.eq.s32.totalorder %v1551_v15, 1  ;;  %v1580_v25 = vsub.s32 4, %v1551_v15  ;;  %vm523_vm15 = vcmp.eq.s32.totalorder %v1551_v15, 0 }
  0x2f   : > { %v1252_v16 = vsel %vm526_vm14, 1.0, %v1378_v1 }
  0x30   : > { %v308_v41 = vcombine.low %v298_v34, %v305_v39 }
  0x32   : > { %v310_v42 = vsub.f32 %v1473_v4, %v308_v41  ;;  %v440_v44 = vld [vmem:[#allocation4 + $0x8] sm:$0xff]  ;;  %v439_v45 = vld [vmem:[#allocation4] sm:$0xff] }
  0x34   : > { %v311_v43 = vmul.f32 1.442695, %v310_v42  ;;  %v442_v46 = vld [vmem:[#allocation4 + $0x18] sm:$0xff]  ;;  %v441_v47 = vld [vmem:[#allocation4 + $0x10] sm:$0xff] }
  0x35   : > { %v1256_v48 = vpack.c.bf16 %v442_v46, %v440_v44  ;;  %v1258_v49 = vpack.c.bf16 %v441_v47, %v439_v45 }
  0x36   : > { %1317 = vpow2.f32 %v311_v43 }
  0x37   : > { %1257 = vmatprep.subr.bf16.mxu0 %v1256_v48 }
  0x38   : > { %1259 = vmatpush1.bf16.xpose.msra.mxu0 %v1258_v49 }
  0x40   : > { %v1318_v50 = vpop.eup %1317 }
  0x41   : > { %v314_v51 = vcombine.high %v1318_v50, %v1318_v50  ;;  %v316_v52 = vsel %vm291_vm2, %v1318_v50, 0.0 }
  0x42   : > { %v317_v53 = vrot.slane %v316_v52, 4 }
  0x43   : > { %v323_v54 = vsel %vm291_vm2, %v314_v51, 0.0 }
  0x44   : > { %v318_v55 = vadd.f32 %v317_v53, %v316_v52  ;;  %v324_v56 = vrot.slane %v323_v54, 4 }
  0x46   : > { %v319_v57 = vrot.slane %v318_v55, 2  ;;  %v325_v58 = vadd.f32 %v324_v56, %v323_v54 }
  0x48   : > { %v320_v59 = vadd.f32 %v319_v57, %v318_v55  ;;  %v326_v60 = vrot.slane %v325_v58, 2 }
  0x4a   : > { %v321_v61 = vrot.slane %v320_v59, 1  ;;  %v327_v62 = vadd.f32 %v326_v60, %v325_v58 }
  0x4c   : > { %v322_v63 = vadd.f32 %v321_v61, %v320_v59  ;;  %v328_v2 = vrot.slane %v327_v62, 1 }
  0x4e   : > { %v329_v3 = vadd.f32 %v328_v2, %v327_v62 }
  0x50   : > { %v332_v4 = vcombine.low %v322_v63, %v329_v3  ;;  %v1650_v3 = vsel %vm523_vm15, 1.0, %v1378_v1 }
  0x52   : > { %1319 = vrcp.f32 %v332_v4 }
  0x5c   : > { %v1320_v5 = vpop.eup %1319 }
  0x5d   : > { %v335_v6 = vmul.f32 %v1320_v5, %v1318_v50 }
  0x5f   : > { %v337_v7 = vcombine.high %v335_v6, %v335_v6  ;;  %339 = vst [vmem:[#allocation3] sm:$0xf] %v335_v6 }
  0x61   : > { %340 = vst [vmem:[#allocation3 + $0x8] sm:$0xf] %v337_v7 }
  0x66   : > { %v437_v8 = vld [vmem:[#allocation3] sm:$0xff] }
  0x68   : > { %v438_v9 = vld [vmem:[#allocation3 + $0x8] sm:$0xff] }
  0x69   : > { %507 = vmatprep.mubr.f32.mxu0 %v438_v9 }
  0x6a   : > { %508 = vmatmul.mubr.f32.vlgmr.msra.gmra.mrb[0].mxu0 %v437_v8 }
 0x13d   : > { %v509_v11 = vpop.f32.mrb[0].mxu0 }
 0x13e   : > { %v514_v12 = vadd.f32 %v513_v10, %v509_v11  ;;  %v511_v13 = vpop.f32.mrb[1].mxu0 }
 0x140   : > { %516 = vst.msk [vmem:[#allocation2] sm:$0xff] %vm272_vm0, %v514_v12  ;;  %vm569_vm0 = vcmask 7168  }
 0x147   : > { %v1540_v14 = vld [vmem:[#allocation2] sm:$0xff] }
 0x148   : > { %655 = vrot.lane.b32.xlu1 %v1540_v14, %s1380_s23  ;;  %585 = vrot.lane.b32.xlu0 %v1540_v14, %s1381_s29  ;;  %v537_v17 = vmul.f32 %v1252_v16, %v1540_v14  ;;  %v551_v47 = vrot.slane %v1540_v14, %v1580_v25 }
 0x14a   : > { %v1614_v51 = vmul.f32 %v1252_v16, %v551_v47 }
 0x14c   : > { %724 = vrot.lane.b32.xlu1 %v1540_v14, %s1382_s30  ;;  %589 = vrot.lane.b32.xlu0 %v1540_v14, %s1383_s5 }
 0x150   : > { %862 = vrot.lane.b32.xlu1 %v1540_v14, %s1384_s6  ;;  %793 = vrot.lane.b32.xlu0 %v1540_v14, %s1385_s7 }
 0x154   : > { %1000 = vrot.lane.b32.xlu1 %v1540_v14, %s1386_s8  ;;  %931 = vrot.lane.b32.xlu0 %v1540_v14, %s1387_s9 }
 0x158   : > { %1069 = vrot.lane.b32.xlu0 %v1540_v14, %s1388_s10  ;;  %539 = vrot.lane.b32.xlu1 %v537_v17, %s1389_s11 }
 0x15c   : > { %670 = vrot.lane.b32.xlu1 %v537_v17, %s1381_s29 }
 0x160   : > { %739 = vrot.lane.b32.xlu1 %v537_v17, %s1383_s5 }
 0x164   : > { %808 = vrot.lane.b32.xlu1 %v537_v17, %s1380_s23 }
 0x1ba   : > { %v1570_v18 = vpop.permute.xlu1 %655  ;;  %v586_v19 = vpop.permute.xlu0 %585 }
 0x1bb   : > { %v588_v20 = vsub.f32 %v1540_v14, %v586_v19  ;;  %v674_v59 = vadd.f32 %v586_v19, %v1540_v14  ;;  %v812_v7 = vadd.f32 %v1570_v18, %v1540_v14 }
 0x1bd   : > { %v658_v21 = vsub.f32 %v588_v20, %v1570_v18 }
 0x1be   : > { %v1574_v22 = vpop.permute.xlu1 %724  ;;  %v1576_v23 = vpop.permute.xlu0 %589 }
 0x1bf   : > { %v592_v24 = vsub.f32 %v588_v20, %v1576_v23  ;;  %v727_v26 = vsub.f32 %v588_v20, %v1574_v22  ;;  %v659_v27 = vmul.f32 0.25, %v658_v21  ;;  %v743_v5 = vadd.f32 %v1576_v23, %v1540_v14 }
 0x1c0   : > { %v881_v15 = vadd.f32 %v1574_v22, %v1540_v14 }
 0x1c1   : > { %v593_v28 = vmul.f32 0.25, %v592_v24  ;;  %v663_v30 = vrot.slane %v659_v27, %v1580_v25  ;;  %v728_v33 = vmul.f32 0.25, %v727_v26 }
 0x1c2   : > { %v1583_v29 = vpop.permute.xlu0 %793  ;;  %v1586_v31 = vpop.permute.xlu1 %862 }
 0x1c3   : > { %v796_v32 = vsub.f32 %v588_v20, %v1583_v29  ;;  %665 = vrot.lane.b32.xlu0 %v663_v30, %s1390_s12  ;;  %v597_v34 = vrot.slane %v593_v28, %v1580_v25  ;;  %v865_v35 = vsub.f32 %v588_v20, %v1586_v31  ;;  %v732_v38 = vrot.slane %v728_v33, %v1580_v25 }
 0x1c4   : > { %v950_v24 = vadd.f32 %v1583_v29, %v1540_v14  ;;  %v1019_v33 = vadd.f32 %v1586_v31, %v1540_v14 }
 0x1c5   : > { %v797_v36 = vmul.f32 0.25, %v796_v32  ;;  %599 = vrot.lane.b32.xlu1 %v597_v34, %s1390_s12  ;;  %v866_v39 = vmul.f32 0.25, %v865_v35 }
 0x1c6   : > { %v1593_v37 = vpop.permute.xlu0 %931  ;;  %v1600_v42 = vpop.permute.xlu1 %1000 }
 0x1c7   : > { %946 = vrot.lane.b32.xlu0 %v537_v17, %s1385_s7  ;;  %v934_v40 = vsub.f32 %v588_v20, %v1593_v37  ;;  %v801_v41 = vrot.slane %v797_v36, %v1580_v25  ;;  %v1003_v43 = vsub.f32 %v588_v20, %v1600_v42  ;;  %v870_v45 = vrot.slane %v866_v39, %v1580_v25 }
 0x1c9   : > { %734 = vrot.lane.b32.xlu1 %v732_v38, %s1390_s12  ;;  %v935_v44 = vmul.f32 0.25, %v934_v40  ;;  %v1004_v48 = vmul.f32 0.25, %v1003_v43 }
 0x1ca   : > { %v1606_v46 = vpop.permute.xlu0 %1069  ;;  %v1638_v55 = vpop.permute.xlu1 %539 }
 0x1cb   : > { %803 = vrot.lane.b32.xlu0 %v801_v41, %s1390_s12  ;;  %v1072_v49 = vsub.f32 %v588_v20, %v1606_v46  ;;  %v939_v50 = vrot.slane %v935_v44, %v1580_v25  ;;  %v1008_v53 = vrot.slane %v1004_v48, %v1580_v25  ;;  %v1088_v41 = vadd.f32 %v1593_v37, %v1540_v14 }
 0x1cd   : > { %877 = vrot.lane.b32.xlu1 %v537_v17, %s1382_s30  ;;  %v1073_v52 = vmul.f32 0.25, %v1072_v49 }
 0x1ce   : > { %v671_v56 = vpop.permute.xlu1 %670 }
 0x1cf   : > { %872 = vrot.lane.b32.xlu0 %v870_v45, %s1390_s12  ;;  %v1077_v54 = vrot.slane %v1073_v52, %v1580_v25 }
 0x1d1   : > { %1015 = vrot.lane.b32.xlu1 %v537_v17, %s1384_s6 }
 0x1d2   : > { %v740_v57 = vpop.permute.xlu1 %739 }
 0x1d3   : > { %941 = vrot.lane.b32.xlu0 %v939_v50, %s1390_s12 }
 0x1d5   : > { %613 = vrot.lane.b32.xlu1 %v1614_v51, %s1383_s5 }
 0x1d6   : > { %v809_v58 = vpop.permute.xlu1 %808 }
 0x1d7   : > { %1010 = vrot.lane.b32.xlu0 %v1008_v53, %s1390_s12 }
 0x1db   : > { %1079 = vrot.lane.b32.xlu0 %v1077_v54, %s1390_s12 }
 0x1df   : > { %1084 = vrot.lane.b32.xlu0 %v537_v17, %s1387_s9 }
 0x1e3   : > { %682 = vrot.lane.b32.xlu0 %v1614_v51, %s1380_s23 }
 0x1e7   : > { %751 = vrot.lane.b32.xlu0 %v1614_v51, %s1382_s30 }
 0x1eb   : > { %820 = vrot.lane.b32.xlu0 %v1614_v51, %s1385_s7 }
 0x1ef   : > { %889 = vrot.lane.b32.xlu0 %v1614_v51, %s1384_s6 }
 0x1f3   : > { %958 = vrot.lane.b32.xlu0 %v1614_v51, %s1387_s9 }
 0x1f7   : > { %1027 = vrot.lane.b32.xlu0 %v1614_v51, %s1386_s8 }
 0x1fb   : > { %1096 = vrot.lane.b32.xlu0 %v1614_v51, %s1388_s10 }
 0x235   : > { %v666_v60 = vpop.permute.xlu0 %665 }
 0x236   : > { %v1642_v61 = vadd.f32 %v674_v59, %v666_v60  ;;  %v668_v63 = vadd.f32 %v666_v60, %v1540_v14 }
 0x237   : > { %v1644_v62 = vpop.permute.xlu1 %599 }
 0x238   : > { %v602_v2 = vadd.f32 %v1644_v62, %v1540_v14  ;;  %v669_v9 = vmul.f32 %v1650_v3, %v668_v63  ;;  %v607_v63 = vsub.f32 %v1540_v14, %v1576_v23  ;;  %v814_v23 = vsub.f32 %v1540_v14, %v1583_v29 }
 0x239   : > { %v947_v4 = vpop.permute.xlu0 %946 }
 0x23a   : > { %v603_v6 = vmul.f32 %v1650_v3, %v602_v2  ;;  %v1670_v16 = vadd.f32 %v671_v56, %v669_v9  ;;  %v676_v2 = vsub.f32 %v1540_v14, %v1570_v18 }
 0x23b   : > { %v735_v8 = vpop.permute.xlu1 %734 }
 0x23c   : > { %v1659_v10 = vadd.f32 %v603_v6, %v1638_v55  ;;  %v737_v11 = vadd.f32 %v735_v8, %v1540_v14  ;;  %v1662_v12 = vadd.f32 %v743_v5, %v735_v8  ;;  %v680_v9 = vrot.slane %v676_v2, %v1580_v25 }
 0x23d   : > { %v804_v1 = vpop.permute.xlu0 %803 }
 0x23e   : > { %v1664_v13 = vadd.f32 %v812_v7, %v804_v1  ;;  %619 = vrot.lane.b32.xlu1 %v1659_v10, %s1381_s29  ;;  %v738_v17 = vmul.f32 %v1650_v3, %v737_v11  ;;  %v806_v19 = vadd.f32 %v804_v1, %v1540_v14  ;;  %v745_v7 = vsub.f32 %v1540_v14, %v1574_v22 }
 0x23f   : > { %v878_v40 = vpop.permute.xlu1 %877  ;;  %v883_v22 = vsub.f32 %v1540_v14, %v1586_v31  ;;  %v1090_v31 = vsub.f32 %v1540_v14, %v1606_v46 }
 0x240   : > { %v1680_v26 = vadd.f32 %v740_v57, %v738_v17  ;;  %v807_v27 = vmul.f32 %v1650_v3, %v806_v19  ;;  %v681_v17 = vmul.f32 %v1650_v3, %v680_v9  ;;  %v749_v18 = vrot.slane %v745_v7, %v1580_v25 }
 0x241   : > { %v873_v20 = vpop.permute.xlu0 %872 }
 0x242   : > { %v1674_v21 = vadd.f32 %v881_v15, %v873_v20  ;;  %688 = vrot.lane.b32.xlu1 %v1670_v16, %s1381_s29  ;;  %v875_v28 = vadd.f32 %v873_v20, %v1540_v14  ;;  %v1690_v34 = vadd.f32 %v809_v58, %v807_v27 }
 0x243   : > { %v1016_v57 = vpop.permute.xlu1 %1015 }
 0x244   : > { %v876_v35 = vmul.f32 %v1650_v3, %v875_v28  ;;  %v750_v28 = vmul.f32 %v1650_v3, %v749_v18 }
 0x245   : > { %v942_v30 = vpop.permute.xlu0 %941 }
 0x246   : > { %v1684_v32 = vadd.f32 %v950_v24, %v942_v30  ;;  %757 = vrot.lane.b32.xlu1 %v1680_v26, %s1381_s29  ;;  %v944_v36 = vadd.f32 %v942_v30, %v1540_v14  ;;  %v1700_v43 = vadd.f32 %v878_v40, %v876_v35  ;;  %v818_v30 = vrot.slane %v814_v23, %v1580_v25 }
 0x247   : > { %v614_v6 = vpop.permute.xlu1 %613  ;;  %v952_v40 = vsub.f32 %v1540_v14, %v1593_v37 }
 0x248   : > { %v945_v44 = vmul.f32 %v1650_v3, %v944_v36 }
 0x249   : > { %v1011_v38 = vpop.permute.xlu0 %1010  ;;  %v956_v37 = vrot.slane %v952_v40, %v1580_v25 }
 0x24a   : > { %v1694_v39 = vadd.f32 %v1019_v33, %v1011_v38  ;;  %826 = vrot.lane.b32.xlu1 %v1690_v34, %s1381_s29  ;;  %v1013_v45 = vadd.f32 %v1011_v38, %v1540_v14  ;;  %v1709_v50 = vadd.f32 %v947_v4, %v945_v44  ;;  %v611_v4 = vrot.slane %v607_v63, %v1580_v25 }
 0x24b   : > { %v887_v44 = vrot.slane %v883_v22, %v1580_v25 }
 0x24c   : > { %v1014_v52 = vmul.f32 %v1650_v3, %v1013_v45  ;;  %v612_v8 = vmul.f32 %v1650_v3, %v611_v4 }
 0x24d   : > { %v1080_v47 = vpop.permute.xlu0 %1079 }
 0x24e   : > { %v1082_v48 = vadd.f32 %v1080_v47, %v1540_v14  ;;  %v1705_v49 = vadd.f32 %v1088_v41, %v1080_v47  ;;  %895 = vrot.lane.b32.xlu1 %v1700_v43, %s1381_s29  ;;  %v1717_v58 = vadd.f32 %v1016_v57, %v1014_v52  ;;  %v616_v11 = vadd.f32 %v614_v6, %v612_v8 }
 0x24f   : > { %v819_v41 = vmul.f32 %v1650_v3, %v818_v30  ;;  %v888_v57 = vmul.f32 %v1650_v3, %v887_v44 }
 0x250   : > { %v1083_v53 = vmul.f32 %v1650_v3, %v1082_v48 }
 0x251   : > { %v1085_v54 = vpop.permute.xlu0 %1084 }
 0x252   : > { %v1713_v56 = vadd.f32 %v1085_v54, %v1083_v53  ;;  %964 = vrot.lane.b32.xlu1 %v1709_v50, %s1381_s29  ;;  %v1021_v54 = vsub.f32 %v1540_v14, %v1600_v42 }
 0x254   : > { %1102 = vrot.lane.b32.xlu0 %v1713_v56, %s1381_s29  ;;  %v1025_v46 = vrot.slane %v1021_v54, %v1580_v25 }
 0x255   : > { %v683_v59 = vpop.permute.xlu0 %682 }
 0x256   : > { %1033 = vrot.lane.b32.xlu1 %v1717_v58, %s1381_s29  ;;  %v685_v20 = vadd.f32 %v683_v59, %v681_v17 }
 0x259   : > { %v752_v60 = vpop.permute.xlu0 %751 }
 0x25a   : > { %532 = vrot.lane.b32.xlu1 %v1540_v14, %s1389_s11  ;;  %v754_v29 = vadd.f32 %v752_v60, %v750_v28  ;;  %v1094_v60 = vrot.slane %v1090_v31, %v1580_v25 }
 0x25c   : > { %v1095_v8 = vmul.f32 %v1650_v3, %v1094_v60 }
 0x25d   : > { %v821_v5 = vpop.permute.xlu0 %820 }
 0x25e   : > { %v823_v47 = vadd.f32 %v821_v5, %v819_v41  ;;  %v957_v5 = vmul.f32 %v1650_v3, %v956_v37  ;;  %v755_v41 = vsub.f32 %v1662_v12, %v1680_v26 }
 0x261   : > { %v890_v1 = vpop.permute.xlu0 %889 }
 0x262   : > { %v892_v63 = vadd.f32 %v890_v1, %v888_v57 }
 0x265   : > { %v959_v35 = vpop.permute.xlu0 %958 }
 0x266   : > { %v961_v7 = vadd.f32 %v959_v35, %v957_v5 }
 0x269   : > { %v1028_v52 = vpop.permute.xlu0 %1027 }
 0x26d   : > { %v1097_v42 = vpop.permute.xlu0 %1096 }
 0x26e   : > { %v1099_v23 = vadd.f32 %v1097_v42, %v1095_v8 }
 0x2b0   : > { %v620_v15 = vpop.permute.xlu1 %619 }
 0x2b1   : > { %v622_v19 = vsub.f32 %v616_v11, %v620_v15  ;;  %v1026_v15 = vmul.f32 %v1650_v3, %v1025_v46 }
 0x2b3   : > { %v625_v24 = vmul.f32 0.7, %v622_v19  ;;  %v1030_v18 = vadd.f32 %v1028_v52, %v1026_v15 }
 0x2b4   : > { %v689_v27 = vpop.permute.xlu1 %688 }
 0x2b5   : > { %v691_v33 = vsub.f32 %v685_v20, %v689_v27  ;;  %627 = vrot.lane.b32.xlu0 %v625_v24, %s1390_s12 }
 0x2b7   : > { %v694_v36 = vmul.f32 0.7, %v691_v33 }
 0x2b8   : > { %v758_v38 = vpop.permute.xlu1 %757 }
 0x2b9   : > { %v760_v45 = vsub.f32 %v754_v29, %v758_v38  ;;  %696 = vrot.lane.b32.xlu1 %v694_v36, %s1390_s12  ;;  %v686_v36 = vsub.f32 %v1642_v61, %v1670_v16  ;;  %v893_v61 = vsub.f32 %v1674_v21, %v1700_v43 }
 0x2bb   : > { %v763_v48 = vmul.f32 0.7, %v760_v45  ;;  %v692_v40 = vmul.f32 0.3, %v686_v36  ;;  %v899_v60 = vmul.f32 0.3, %v893_v61 }
 0x2bc   : > { %v827_v53 = vpop.permute.xlu1 %826 }
 0x2bd   : > { %v829_v59 = vsub.f32 %v823_v47, %v827_v53  ;;  %765 = vrot.lane.b32.xlu0 %v763_v48, %s1390_s12  ;;  %v824_v47 = vsub.f32 %v1664_v13, %v1690_v34  ;;  %v962_v13 = vsub.f32 %v1684_v32, %v1709_v50  ;;  %v900_v21 = vadd.f32 %v899_v60, %v1700_v43 }
 0x2bf   : > { %v832_v2 = vmul.f32 0.7, %v829_v59  ;;  %v830_v54 = vmul.f32 0.3, %v824_v47  ;;  %v968_v42 = vmul.f32 0.3, %v962_v13 }
 0x2c0   : > { %v896_v4 = vpop.permute.xlu1 %895 }
 0x2c1   : > { %v898_v6 = vsub.f32 %v892_v63, %v896_v4  ;;  %834 = vrot.lane.b32.xlu1 %v832_v2, %s1390_s12  ;;  %v831_v2 = vadd.f32 %v830_v54, %v1690_v34 }
 0x2c3   : > { %v901_v9 = vmul.f32 0.7, %v898_v6 }
 0x2c4   : > { %v965_v11 = vpop.permute.xlu1 %964 }
 0x2c5   : > { %v967_v17 = vsub.f32 %v961_v7, %v965_v11  ;;  %903 = vrot.lane.b32.xlu0 %v901_v9, %s1390_s12  ;;  %v1031_v7 = vsub.f32 %v1694_v39, %v1717_v58  ;;  %v1100_v9 = vsub.f32 %v1705_v49, %v1713_v56 }
 0x2c6   : > { %v1103_v1 = vpop.permute.xlu0 %1102 }
 0x2c7   : > { %v970_v19 = vmul.f32 0.7, %v967_v17  ;;  %v1105_v20 = vsub.f32 %v1099_v23, %v1103_v1  ;;  %v1037_v1 = vmul.f32 0.3, %v1031_v7 }
 0x2c8   : > { %v1034_v24 = vpop.permute.xlu1 %1033 }
 0x2c9   : > { %v1036_v27 = vsub.f32 %v1030_v18, %v1034_v24  ;;  %972 = vrot.lane.b32.xlu1 %v970_v19, %s1390_s12  ;;  %v1108_v22 = vmul.f32 0.7, %v1105_v20  ;;  %v969_v19 = vadd.f32 %v968_v42, %v1709_v50  ;;  %v1106_v20 = vmul.f32 0.3, %v1100_v9 }
 0x2cb   : > { %v1039_v28 = vmul.f32 0.7, %v1036_v27 }
 0x2cc   : > { %v533_v30 = vpop.permute.xlu1 %532 }
 0x2cd   : > { %1110 = vrot.lane.b32.xlu1 %v1108_v22, %s1390_s12  ;;  %1041 = vrot.lane.b32.xlu0 %v1039_v28, %s1390_s12  ;;  %v605_v33 = vadd.f32 %v533_v30, %v1540_v14  ;;  %v535_v46 = vsub.f32 %v1540_v14, %v533_v30  ;;  %v1038_v30 = vadd.f32 %v1037_v1, %v1717_v58 }
 0x2cf   : > { %v606_v35 = vadd.f32 %v605_v33, %v1644_v62  ;;  %v693_v62 = vadd.f32 %v692_v40, %v1670_v16  ;;  %v536_v15 = vmul.f32 %v1650_v3, %v535_v46  ;;  %v546_v22 = vrot.slane %v535_v46, %v1580_v25 }
 0x2d0   : > { %v1107_v33 = vadd.f32 %v1106_v20, %v1713_v56 }
 0x2d1   : > { %554 = vrot.lane.b32.xlu0 %v1614_v51, %s1389_s11  ;;  %v617_v29 = vsub.f32 %v606_v35, %v1659_v10  ;;  %v761_v51 = vmul.f32 0.3, %v755_v41  ;;  %v542_v49 = vadd.f32 %v1638_v55, %v536_v15  ;;  %v547_v25 = vmul.f32 %v1650_v3, %v546_v22 }
 0x2d3   : > { %v623_v38 = vmul.f32 0.3, %v617_v29  ;;  %v762_v12 = vadd.f32 %v761_v51, %v1680_v26  ;;  %v558_v55 = vsub.f32 %v1540_v14, %v542_v49 }
 0x2d5   : > { %v624_v44 = vadd.f32 %v623_v38, %v1659_v10  ;;  %v560_v47 = vmul.f32 0.3, %v558_v55 }
 0x327   : > { %v628_v45 = vpop.permute.xlu0 %627 }
 0x328   : > { %v630_v31 = vadd.f32 %v628_v45, %v624_v44 }
 0x32a   : > { %v632_v48 = vmax.f32 %v630_v31, 1e-08 }
 0x32b   : > { %v697_v52 = vpop.permute.xlu1 %696 }
 0x32c   : > { %1321 = vrcp.f32 %v632_v48  ;;  %v699_v53 = vadd.f32 %v697_v52, %v693_v62  ;;  %v561_v62 = vadd.f32 %v560_v47, %v542_v49 }
 0x32e   : > { %v701_v57 = vmax.f32 %v699_v53, 1e-08 }
 0x32f   : > { %v766_v37 = vpop.permute.xlu0 %765 }
 0x330   : > { %1323 = vrcp.f32 %v701_v57  ;;  %v768_v59 = vadd.f32 %v766_v37, %v762_v12 }
 0x332   : > { %v770_v63 = vmax.f32 %v768_v59, 1e-08 }
 0x333   : > { %v835_v4 = vpop.permute.xlu1 %834 }
 0x334   : > { %1325 = vrcp.f32 %v770_v63  ;;  %v837_v5 = vadd.f32 %v835_v4, %v831_v2 }
 0x336   : > { %v1322_v6 = vpop.eup %1321  ;;  %v839_v8 = vmax.f32 %v837_v5, 1e-08 }
 0x337   : > { %v904_v32 = vpop.permute.xlu0 %903  ;;  %v635_v11 = vmul.f32 %v1322_v6, %v1659_v10 }
 0x338   : > { %1327 = vrcp.f32 %v839_v8  ;;  %v906_v23 = vadd.f32 %v904_v32, %v900_v21 }
 0x339   : > { %637 = vrot.lane.b32.xlu0 %v635_v11, %s1381_s29 }
 0x33a   : > { %v1324_v17 = vpop.eup %1323  ;;  %v908_v18 = vmax.f32 %v906_v23, 1e-08 }
 0x33b   : > { %v973_v39 = vpop.permute.xlu1 %972  ;;  %v704_v24 = vmul.f32 %v1324_v17, %v1670_v16 }
 0x33c   : > { %1329 = vrcp.f32 %v908_v18  ;;  %v975_v27 = vadd.f32 %v973_v39, %v969_v19 }
 0x33d   : > { %706 = vrot.lane.b32.xlu0 %v704_v24, %s1381_s29 }
 0x33e   : > { %v1326_v10 = vpop.eup %1325  ;;  %v977_v28 = vmax.f32 %v975_v27, 1e-08 }
 0x33f   : > { %v1042_v35 = vpop.permute.xlu0 %1041  ;;  %v1111_v29 = vpop.permute.xlu1 %1110  ;;  %v773_v36 = vmul.f32 %v1326_v10, %v1680_v26 }
 0x340   : > { %1331 = vrcp.f32 %v977_v28  ;;  %v1044_v16 = vadd.f32 %v1042_v35, %v1038_v30  ;;  %v1113_v38 = vadd.f32 %v1111_v29, %v1107_v33 }
 0x341   : > { %775 = vrot.lane.b32.xlu0 %v773_v36, %s1381_s29 }
 0x342   : > { %v1328_v40 = vpop.eup %1327  ;;  %v1046_v41 = vmax.f32 %v1044_v16, 1e-08  ;;  %v1115_v44 = vmax.f32 %v1113_v38, 1e-08 }
 0x343   : > { %v555_v45 = vpop.permute.xlu0 %554  ;;  %v842_v31 = vmul.f32 %v1328_v40, %v1690_v34 }
 0x344   : > { %1333 = vrcp.f32 %v1046_v41  ;;  %v557_v51 = vadd.f32 %v555_v45, %v547_v25 }
 0x345   : > { %844 = vrot.lane.b32.xlu0 %v842_v31, %s1381_s29  ;;  %1335 = vrcp.f32 %v1115_v44 }
 0x346   : > { %v1330_v26 = vpop.eup %1329  ;;  %v559_v48 = vsub.f32 %v557_v51, %v542_v49 }
 0x347   : > { %v911_v14 = vmul.f32 %v1330_v26, %v1700_v43 }
 0x348   : > { %v562_v52 = vmul.f32 0.7, %v559_v48 }
 0x349   : > { %913 = vrot.lane.b32.xlu0 %v911_v14, %s1381_s29 }
 0x34a   : > { %v1332_v53 = vpop.eup %1331  ;;  %v563_v61 = vadd.f32 %v562_v52, %v561_v62 }
 0x34b   : > { %v980_v3 = vmul.f32 %v1332_v53, %v1709_v50 }
 0x34c   : > { %v565_v54 = vmax.f32 %v563_v61, 1e-08 }
 0x34d   : > { %982 = vrot.lane.b32.xlu0 %v980_v3, %s1381_s29 }
 0x34e   : > { %v1334_v34 = vpop.eup %1333  ;;  %1337 = vrcp.f32 %v565_v54 }
 0x34f   : > { %v1049_v57 = vmul.f32 %v1334_v34, %v1717_v58  ;;  %v1336_v12 = vpop.eup %1335 }
 0x350   : > { %v1118_v43 = vmul.f32 %v1336_v12, %v1713_v56 }
 0x351   : > { %1051 = vrot.lane.b32.xlu0 %v1049_v57, %s1381_s29 }
 0x355   : > { %1120 = vrot.lane.b32.xlu0 %v1118_v43, %s1381_s29 }
 0x358   : > { %v1338_v37 = vpop.eup %1337 }
 0x359   : > { %v568_v59 = vmul.f32 %v1338_v37, %v542_v49 }
 0x35b   : > { %v570_v60 = vsel %vm569_vm0, %v568_v59, 0.0 }
 0x35c   : > { %571 = vadd.xlane.f32.xlu1 %v570_v60 }
 0x3ab   : > { %v638_v50 = vpop.permute.xlu0 %637 }
 0x3ac   : > { %v640_v13 = vsel %vm569_vm0, %v638_v50, 0.0 }
 0x3ad   : > { %641 = vadd.xlane.f32.xlu0 %v640_v13 }
 0x3af   : > { %v707_v63 = vpop.permute.xlu0 %706 }
 0x3b0   : > { %v709_v58 = vsel %vm569_vm0, %v707_v63, 0.0 }
 0x3b1   : > { %710 = vadd.xlane.f32.xlu1 %v709_v58 }
 0x3b3   : > { %v776_v2 = vpop.permute.xlu0 %775 }
 0x3b4   : > { %v778_v4 = vsel %vm569_vm0, %v776_v2, 0.0 }
 0x3b5   : > { %779 = vadd.xlane.f32.xlu1 %v778_v4 }
 0x3b7   : > { %v845_v56 = vpop.permute.xlu0 %844 }
 0x3b8   : > { %v847_v46 = vsel %vm569_vm0, %v845_v56, 0.0 }
 0x3b9   : > { %848 = vadd.xlane.f32.xlu1 %v847_v46 }
 0x3bb   : > { %v914_v5 = vpop.permute.xlu0 %913 }
 0x3bc   : > { %v916_v21 = vsel %vm569_vm0, %v914_v5, 0.0 }
 0x3bd   : > { %917 = vadd.xlane.f32.xlu1 %v916_v21 }
 0x3bf   : > { %v983_v6 = vpop.permute.xlu0 %982 }
 0x3c0   : > { %v985_v42 = vsel %vm569_vm0, %v983_v6, 0.0 }
 0x3c1   : > { %986 = vadd.xlane.f32.xlu1 %v985_v42 }
 0x3c3   : > { %v1052_v7 = vpop.permute.xlu0 %1051 }
 0x3c4   : > { %v1054_v8 = vsel %vm569_vm0, %v1052_v7, 0.0 }
 0x3c5   : > { %1055 = vadd.xlane.f32.xlu1 %v1054_v8 }
 0x3c7   : > { %v1121_v9 = vpop.permute.xlu0 %1120 }
 0x3c8   : > { %v1123_v32 = vsel %vm569_vm0, %v1121_v9, 0.0 }
 0x3c9   : > { %1124 = vadd.xlane.f32.xlu1 %v1123_v32 }
 0x3e9   : > { %v572_v11 = vpop.xlane.xlu1 %571 }
 0x3ea   : > { %v573_v15 = vrot.slane %v572_v11, 4 }
 0x3ec   : > { %v574_v23 = vadd.f32 %v573_v15, %v572_v11  ;;  %v530_v11 = vand.u32 127, %v280_v0 }
 0x3ee   : > { %v575_v17 = vrot.slane %v574_v23, 2  ;;  %vm582_vm1 = vcmp.eq.s32.totalorder %v530_v11, 0  ;;  %vm652_vm2 = vcmp.eq.s32.totalorder %v530_v11, 1  ;;  %vm721_vm3 = vcmp.eq.s32.totalorder %v530_v11, 2 }
 0x3ef   : > { %vm790_vm4 = vcmp.eq.s32.totalorder %v530_v11, 3  ;;  %vm859_vm5 = vcmp.eq.s32.totalorder %v530_v11, 4  ;;  %vm928_vm6 = vcmp.eq.s32.totalorder %v530_v11, 5  ;;  %vm997_vm7 = vcmp.eq.s32.totalorder %v530_v11, 6 }
 0x3f0   : > { %v576_v1 = vadd.f32 %v575_v17, %v574_v23  ;;  %vm1066_vm8 = vcmp.eq.s32.totalorder %v530_v11, 7  ;;  %vm1135_vm9 = vcmp.eq.s32.totalorder %v530_v11, 8 }
 0x3f2   : > { %v577_v18 = vrot.slane %v576_v1, 1 }
 0x3f4   : > { %v578_v19 = vadd.f32 %v577_v18, %v576_v1 }
 0x3f6   : > { %1260 = vpush %v578_v19 }
 0x427   : > { %s1261_s13 = spop %1260 }
 0x428   : > { %s580_s15 = ssub.f32 0.0, %s1261_s13 }
 0x42a   : > { %s581_s26 = smul.f32 0.25, %s580_s15 }
 0x42c   : > { %v583_v15 = vstv %s581_s26 }
 0x42d   : > { %v584_v1 = vsel %vm582_vm1, %v583_v15, 0.0 }
 0x43a   : > { %v642_v20 = vpop.xlane.xlu0 %641 }
 0x43b   : > { %v643_v39 = vrot.slane %v642_v20, 4 }
 0x43d   : > { %v644_v24 = vadd.f32 %v643_v39, %v642_v20 }
 0x43e   : > { %v711_v49 = vpop.xlane.xlu1 %710 }
 0x43f   : > { %v645_v27 = vrot.slane %v644_v24, 2  ;;  %v712_v10 = vrot.slane %v711_v49, 4 }
 0x441   : > { %v646_v22 = vadd.f32 %v645_v27, %v644_v24  ;;  %v713_v28 = vadd.f32 %v712_v10, %v711_v49 }
 0x442   : > { %v780_v30 = vpop.xlane.xlu1 %779 }
 0x443   : > { %v714_v33 = vrot.slane %v713_v28, 2  ;;  %v781_v35 = vrot.slane %v780_v30, 4  ;;  %v647_v29 = vrot.slane %v646_v22, 1 }
 0x445   : > { %v782_v36 = vadd.f32 %v781_v35, %v780_v30  ;;  %v648_v16 = vadd.f32 %v647_v29, %v646_v22  ;;  %v715_v38 = vadd.f32 %v714_v33, %v713_v28 }
 0x446   : > { %v849_v55 = vpop.xlane.xlu1 %848 }
 0x447   : > { %v783_v40 = vrot.slane %v782_v36, 2  ;;  %v850_v41 = vrot.slane %v849_v55, 4  ;;  %1262 = vpush %v648_v16  ;;  %v716_v44 = vrot.slane %v715_v38, 1 }
 0x449   : > { %v851_v25 = vadd.f32 %v850_v41, %v849_v55  ;;  %v717_v45 = vadd.f32 %v716_v44, %v715_v38  ;;  %v784_v31 = vadd.f32 %v783_v40, %v782_v36 }
 0x44a   : > { %v918_v51 = vpop.xlane.xlu1 %917 }
 0x44b   : > { %v852_v47 = vrot.slane %v851_v25, 2  ;;  %v919_v26 = vrot.slane %v918_v51, 4  ;;  %1264 = vpush %v717_v45  ;;  %v785_v48 = vrot.slane %v784_v31, 1 }
 0x44d   : > { %v920_v14 = vadd.f32 %v919_v26, %v918_v51  ;;  %v786_v62 = vadd.f32 %v785_v48, %v784_v31  ;;  %v853_v52 = vadd.f32 %v852_v47, %v851_v25 }
 0x44e   : > { %v987_v53 = vpop.xlane.xlu1 %986 }
 0x44f   : > { %v921_v61 = vrot.slane %v920_v14, 2  ;;  %v988_v3 = vrot.slane %v987_v53, 4  ;;  %1266 = vpush %v786_v62  ;;  %v854_v54 = vrot.slane %v853_v52, 1 }
 0x451   : > { %v989_v34 = vadd.f32 %v988_v3, %v987_v53  ;;  %v855_v57 = vadd.f32 %v854_v54, %v853_v52  ;;  %v922_v12 = vadd.f32 %v921_v61, %v920_v14 }
 0x452   : > { %v1056_v43 = vpop.xlane.xlu1 %1055 }
 0x453   : > { %v990_v37 = vrot.slane %v989_v34, 2  ;;  %v1057_v59 = vrot.slane %v1056_v43, 4  ;;  %1268 = vpush %v855_v57  ;;  %v923_v60 = vrot.slane %v922_v12, 1 }
 0x455   : > { %v1058_v50 = vadd.f32 %v1057_v59, %v1056_v43  ;;  %v924_v13 = vadd.f32 %v923_v60, %v922_v12  ;;  %v991_v63 = vadd.f32 %v990_v37, %v989_v34 }
 0x456   : > { %v1125_v58 = vpop.xlane.xlu1 %1124 }
 0x457   : > { %v1059_v2 = vrot.slane %v1058_v50, 2  ;;  %v1126_v4 = vrot.slane %v1125_v58, 4  ;;  %1270 = vpush %v924_v13  ;;  %v992_v56 = vrot.slane %v991_v63, 1 }
 0x459   : > { %v1127_v46 = vadd.f32 %v1126_v4, %v1125_v58  ;;  %v993_v5 = vadd.f32 %v992_v56, %v991_v63  ;;  %v1060_v21 = vadd.f32 %v1059_v2, %v1058_v50 }
 0x45b   : > { %v1128_v6 = vrot.slane %v1127_v46, 2  ;;  %1272 = vpush %v993_v5  ;;  %v1061_v42 = vrot.slane %v1060_v21, 1 }
 0x45d   : > { %v1129_v7 = vadd.f32 %v1128_v6, %v1127_v46  ;;  %v1062_v8 = vadd.f32 %v1061_v42, %v1060_v21 }
 0x45f   : > { %1274 = vpush %v1062_v8  ;;  %v1130_v9 = vrot.slane %v1129_v7, 1 }
 0x461   : > { %v1131_v32 = vadd.f32 %v1130_v9, %v1129_v7 }
 0x463   : > { %1276 = vpush %v1131_v32 }
 0x478   : > { %s1263_s14 = spop %1262 }
 0x479   : > { %s650_s17 = ssub.f32 0.0, %s1263_s14 }
 0x47b   : > { %s651_s28 = smul.f32 0.25, %s650_s17 }
 0x47c   : > { %s1265_s16 = spop %1264 }
 0x47d   : > { %s719_s24 = ssub.f32 0.0, %s1265_s16  ;;  %v653_v23 = vstv %s651_s28 }
 0x47e   : > { %v654_v18 = vsel %vm652_vm2, %v653_v23, %v584_v1 }
 0x47f   : > { %s720_s5 = smul.f32 0.25, %s719_s24 }
 0x480   : > { %s1267_s18 = spop %1266 }
 0x481   : > { %s788_s27 = ssub.f32 0.0, %s1267_s18  ;;  %v722_v17 = vstv %s720_s5 }
 0x482   : > { %v723_v20 = vsel %vm721_vm3, %v722_v17, %v654_v18 }
 0x483   : > { %s789_s7 = smul.f32 0.25, %s788_s27 }
 0x484   : > { %s1269_s19 = spop %1268 }
 0x485   : > { %s857_s23 = ssub.f32 0.0, %s1269_s19  ;;  %v791_v0 = vstv %s789_s7  ;;  %s267_s19 = scalar_lea.vmem %s1841_s4, %s1849_s20 }
 0x486   : > { %v792_v24 = vsel %vm790_vm4, %v791_v0, %v723_v20 }
 0x487   : > { %s858_s8 = smul.f32 0.25, %s857_s23 }
 0x488   : > { %s1271_s25 = spop %1270 }
 0x489   : > { %s926_s29 = ssub.f32 0.0, %s1271_s25  ;;  %v860_v19 = vstv %s858_s8 }
 0x48a   : > { %v861_v27 = vsel %vm859_vm5, %v860_v19, %v792_v24 }
 0x48b   : > { %s927_s9 = smul.f32 0.25, %s926_s29 }
 0x48c   : > { %s1273_s30 = spop %1272 }
 0x48d   : > { %s995_s6 = ssub.f32 0.0, %s1273_s30  ;;  %v929_v39 = vstv %s927_s9 }
 0x48e   : > { %v930_v22 = vsel %vm928_vm6, %v929_v39, %v861_v27 }
 0x48f   : > { %s996_s11 = smul.f32 0.25, %s995_s6 }
 0x490   : > { %s1275_s10 = spop %1274 }
 0x491   : > { %s1064_s12 = ssub.f32 0.0, %s1275_s10  ;;  %v998_v49 = vstv %s996_s11 }
 0x492   : > { %v999_v28 = vsel %vm997_vm7, %v998_v49, %v930_v22 }
 0x493   : > { %s1065_s13 = smul.f32 0.25, %s1064_s12 }
 0x494   : > { %s1277_s14 = spop %1276 }
 0x495   : > { %s1133_s15 = ssub.f32 0.0, %s1277_s14  ;;  %v1067_v10 = vstv %s1065_s13 }
 0x496   : > { %v1068_v30 = vsel %vm1066_vm8, %v1067_v10, %v999_v28 }
 0x497   : > { %s1134_s16 = smul.f32 0.25, %s1133_s15 }
 0x499   : > { %v1136_v33 = vstv %s1134_s16 }
 0x49a   : > { %v1137_v35 = vsel %vm1135_vm9, %v1136_v33, %v1068_v30 }
 0x49b   : > { %1138 = vst [vmem:[%s267_s19] sm:$0x1] %v1137_v35 }
 0x49c PF: > { %s20_s22 = sadd.s32 1, %s1375_s22   ;;  %s1844_s20 = smov %s1371_s21 }
 0x49d   : > { %p17_p10 = scmp.ge.s32.totalorder %s20_s22, 4   ;;  %s1845_s21 = smov %s1847_s0 }
 0x49f   :  { %19 = sbr.rel (!%p17_p10) target bundleno = 17 (0x11), region = 87 }

</bundles_post_ra>
